<compile_context>
chip_gen: v5e
topology: v5e:2x2
jax: 0.10.0
libtpu: 0.0.40
codegen_flags: <defaults>
</compile_context>

<pallas_src>
import jax
import jax.numpy as jnp
from jax.experimental import pallas as pl
from jax.experimental.pallas import tpu as pltpu


def _round_up(x, m):
    return ((x + m - 1) // m) * m


def _make_kernel(num_layers):
    def kernel(*refs):
        # refs = (emb1_tile, emb2_tile, w1t, b1, w2t, b2, ..., out_tile)
        e1_ref, e2_ref = refs[0], refs[1]
        layer_refs = refs[2:2 + 2 * num_layers]
        out_ref = refs[-1]
        tn = e1_ref.shape[0]

        # Both embeddings go through the SAME MLP: run it once on the row-concat.
        # Sublane-axis concat; tn is a multiple of 8 so no relayout is needed.
        h = jnp.concatenate([e1_ref[...], e2_ref[...]], axis=0)   # (2*tn, in_dim)

        for li in range(num_layers):
            w = layer_refs[2 * li][...]                            # [K, M] = W^T (compute dtype)
            b = layer_refs[2 * li + 1][...].astype(jnp.float32)    # [1, M]  (f32)
            # Matmul in the weight dtype (bf16 by default), f32 accumulation on the MXU.
            h = jnp.dot(h.astype(w.dtype), w,
                        preferred_element_type=jnp.float32) + b
            if li < num_layers - 1:
                h = jnp.maximum(h, 0.0)  # ReLU (f32, VPU)
                # TODO(synk): nn.Dropout with p>0 in training mode is not implemented
                # (the module default p=0.0 is an identity).

        z1 = h[:tn, :]
        z2 = h[tn:, :]
        # logp = -(max(z1,z2)).sum(-1) + z2.sum(-1) == sum(min(z2 - z1, 0), -1)
        logp = jnp.sum(jnp.minimum(z2 - z1, 0.0), axis=-1, keepdims=True)
        out_ref[...] = logp.astype(out_ref.dtype)

    return kernel


def neural_poe_forward(idx1, idx2, emb1, emb2, params, *, tn=1024,
                       compute_dtype=jnp.bfloat16):
    """NeuralPOE forward.

    idx1, idx2    : unused by the reference forward (kept for signature parity).
    emb1, emb2    : [..., input_dim]
    params        : list of (W, b) per nn.Linear, PyTorch convention W:[out,in], b:[out].
    tn            : row tile (rows per grid step); 1024 default fits every generation
                    with vmem_limit_bytes=32MiB.
    compute_dtype : matmul operand dtype (bf16 default; accumulation is always f32).
    """
    del idx1, idx2
    assert emb1.shape == emb2.shape
    num_layers = len(params)
    lead = emb1.shape[:-1]
    in_dim = emb1.shape[-1]
    out_dtype = emb1.dtype

    e1 = emb1.reshape(-1, in_dim).astype(compute_dtype)
    e2 = emb2.reshape(-1, in_dim).astype(compute_dtype)
    n = e1.shape[0]

    # Row-tile sizing: stay legal for tiny N, and keep the grid length even so both
    # of v7x's TensorCores get balanced work under dimension_semantics=("parallel",).
    tn = min(tn, _round_up(n, 8))
    tiles = -(-n // tn)
    if tiles > 1 and tiles % 2 == 1:
        tiles += 1
    tn = _round_up(-(-n // tiles), 8)
    n_pad = tiles * tn
    if n_pad != n:
        pad = ((0, n_pad - n), (0, 0))
        e1 = jnp.pad(e1, pad)
        e2 = jnp.pad(e2, pad)

    # Pre-transpose weights (kernel computes x @ W^T) and cast to the compute dtype;
    # biases stay f32 rows [1, M] (added after the f32-accumulated matmul).
    flat_params = []
    for w, b in params:
        flat_params.append(w.T.astype(compute_dtype))        # [in, out]
        flat_params.append(b.reshape(1, -1).astype(jnp.float32))

    grid = (tiles,)

    in_specs = [
        pl.BlockSpec((tn, in_dim), lambda i: (i, 0)),  # emb1 tile (streamed)
        pl.BlockSpec((tn, in_dim), lambda i: (i, 0)),  # emb2 tile (streamed)
    ]
    for p in flat_params:
        # Resident weights/biases: block == full array, constant block index -> no re-DMA.
        in_specs.append(pl.BlockSpec(p.shape, lambda i: (0, 0)))

    flops = n_pad * 2 * sum(2 * w.shape[0] * w.shape[1] for w, _ in params)  # both branches
    bytes_accessed = int((e1.size + e2.size) * e1.dtype.itemsize
                         + sum(p.size * p.dtype.itemsize for p in flat_params)
                         + n_pad * jnp.dtype(out_dtype).itemsize)

    out = pl.pallas_call(
        _make_kernel(num_layers),
        out_shape=jax.ShapeDtypeStruct((n_pad, 1), out_dtype),
        grid_spec=pltpu.PrefetchScalarGridSpec(
            num_scalar_prefetch=0,
            grid=grid,
            in_specs=in_specs,
            out_specs=pl.BlockSpec((tn, 1), lambda i: (i, 0)),
        ),
        compiler_params=pltpu.CompilerParams(
            dimension_semantics=("parallel",),
            vmem_limit_bytes=32 * 1024 * 1024),
        cost_estimate=pl.CostEstimate(
            flops=flops, transcendentals=0, bytes_accessed=bytes_accessed),
    )(e1, e2, *flat_params)

    return out[:n, 0].reshape(lead)


def _reference(emb1, emb2, params, compute_dtype=None):
    """Pure-JAX reference. If compute_dtype is given, matmul operands are cast to it
    (matching the kernel's mixed-precision path) with f32 accumulation."""
    def mlp(x):
        h = x
        for li, (w, b) in enumerate(params):
            if compute_dtype is not None:
                h = jnp.dot(h.astype(compute_dtype), w.T.astype(compute_dtype),
                            preferred_element_type=jnp.float32) + b
            else:
                h = h @ w.T + b
            if li < len(params) - 1:
                h = jax.nn.relu(h)
        return h

    z1 = mlp(emb1)
    z2 = mlp(emb2)
    meet = jnp.maximum(z1, z2)
    log_overlap = -jnp.sum(meet, axis=-1)
    log_rhs = -jnp.sum(z2, axis=-1)
    return log_overlap - log_rhs


if __name__ == "__main__":
    key = jax.random.PRNGKey(0)
    # Small demo at module defaults hidden_dim=128, num_layers=3.
    N, input_dim, hidden_dim, output_dim = 1024, 32, 128, 16

    keys = jax.random.split(key, 8)
    emb1 = jax.random.normal(keys[0], (N, input_dim), dtype=jnp.float32)
    emb2 = jax.random.normal(keys[1], (N, input_dim), dtype=jnp.float32)

    # PyTorch-style nn.Linear init (uniform +/- 1/sqrt(fan_in)).
    dims = [(input_dim, hidden_dim), (hidden_dim, hidden_dim), (hidden_dim, output_dim)]
    params = []
    for li, (fan_in, fan_out) in enumerate(dims):
        bound = 1.0 / float(jnp.sqrt(jnp.float32(fan_in)))
        w = jax.random.uniform(keys[2 + 2 * li], (fan_out, fan_in),
                               dtype=jnp.float32, minval=-bound, maxval=bound)
        b = jax.random.uniform(keys[3 + 2 * li], (fan_out,),
                               dtype=jnp.float32, minval=-bound, maxval=bound)
        params.append((w, b))

    # idx1/idx2 exist in the torch signature but are unused in forward.
    idx1 = jnp.arange(N, dtype=jnp.int32)
    idx2 = jnp.arange(N, dtype=jnp.int32)

    # Main (bf16-operand) path: grid of 4 steps -> 2 per TensorCore on v7x.
    out_bf16 = neural_poe_forward(idx1, idx2, emb1, emb2, params, tn=256)
    out_bf16 = jax.block_until_ready(out_bf16)
    ref_bf16 = _reference(emb1, emb2, params, compute_dtype=jnp.bfloat16)
    assert out_bf16.shape == (N,), out_bf16.shape
    assert jnp.allclose(out_bf16, ref_bf16, rtol=1e-3, atol=1e-3), \
        float(jnp.max(jnp.abs(out_bf16 - ref_bf16)))

    # Full-f32 path: exact-parity check against the pure-f32 reference.
    out_f32 = neural_poe_forward(idx1, idx2, emb1, emb2, params, tn=256,
                                 compute_dtype=jnp.float32)
    out_f32 = jax.block_until_ready(out_f32)
    ref_f32 = _reference(emb1, emb2, params)
    assert jnp.allclose(out_f32, ref_f32, rtol=1e-3, atol=1e-3), \
        float(jnp.max(jnp.abs(out_f32 - ref_f32)))

    print("KERNEL_OK")
</pallas_src>

<mosaic_0001>
module attributes {stable_mosaic.version = 11 : i64} {
  func.func @kernel(%arg0: i32, %arg1: memref<256x32xbf16, #tpu.memory_space<vmem>>, %arg2: memref<256x32xbf16, #tpu.memory_space<vmem>>, %arg3: memref<32x128xbf16, #tpu.memory_space<vmem>>, %arg4: memref<1x128xf32, #tpu.memory_space<vmem>>, %arg5: memref<128x128xbf16, #tpu.memory_space<vmem>>, %arg6: memref<1x128xf32, #tpu.memory_space<vmem>>, %arg7: memref<128x16xbf16, #tpu.memory_space<vmem>>, %arg8: memref<1x16xf32, #tpu.memory_space<vmem>>, %arg9: memref<256x1xf32, #tpu.memory_space<vmem>>) attributes {dimension_semantics = [#tpu.dimension_semantics<parallel>], iteration_bounds = array<i64: 4>, scalar_prefetch = 0 : i64, scratch_operands = 0 : i64, tpu.core_type = #tpu.core_type<tc>, window_params = [{transform_indices = @transform_0, window_bounds = array<i64: 256, 32>}, {transform_indices = @transform_1, window_bounds = array<i64: 256, 32>}, {pipeline_mode = #tpu.pipeline_mode<synchronous>, transform_indices = @transform_2, window_bounds = array<i64: 32, 128>}, {pipeline_mode = #tpu.pipeline_mode<synchronous>, transform_indices = @transform_3, window_bounds = array<i64: 1, 128>}, {pipeline_mode = #tpu.pipeline_mode<synchronous>, transform_indices = @transform_4, window_bounds = array<i64: 128, 128>}, {pipeline_mode = #tpu.pipeline_mode<synchronous>, transform_indices = @transform_5, window_bounds = array<i64: 1, 128>}, {pipeline_mode = #tpu.pipeline_mode<synchronous>, transform_indices = @transform_6, window_bounds = array<i64: 128, 16>}, {pipeline_mode = #tpu.pipeline_mode<synchronous>, transform_indices = @transform_7, window_bounds = array<i64: 1, 16>}, {transform_indices = @transform_8, window_bounds = array<i64: 256, 1>}]} {
    %c0 = arith.constant 0 : index
    %c0_0 = arith.constant 0 : index
    %0 = vector.load %arg1[%c0, %c0_0] : memref<256x32xbf16, #tpu.memory_space<vmem>>, vector<256x32xbf16>
    %c0_1 = arith.constant 0 : index
    %c0_2 = arith.constant 0 : index
    %1 = vector.load %arg2[%c0_1, %c0_2] : memref<256x32xbf16, #tpu.memory_space<vmem>>, vector<256x32xbf16>
    %2 = tpu.concatenate %0, %1 in 0 : vector<256x32xbf16>, vector<256x32xbf16> -> vector<512x32xbf16>
    %c0_3 = arith.constant 0 : index
    %c0_4 = arith.constant 0 : index
    %3 = vector.load %arg3[%c0_3, %c0_4] : memref<32x128xbf16, #tpu.memory_space<vmem>>, vector<32x128xbf16>
    %c0_5 = arith.constant 0 : index
    %c0_6 = arith.constant 0 : index
    %4 = vector.load %arg4[%c0_5, %c0_6] : memref<1x128xf32, #tpu.memory_space<vmem>>, vector<1x128xf32>
    %cst = arith.constant dense<0.000000e+00> : vector<512x128xf32>
    %5 = tpu.matmul %2, %3, %cst {dimension_numbers = #tpu.dot_dimension_numbers<[1], [0], [0], [1], [0, 0, 1, 1], [], []>} : vector<512x32xbf16>, vector<32x128xbf16>, vector<512x128xf32> -> vector<512x128xf32>
    %6 = vector.broadcast %4 : vector<1x128xf32> to vector<512x128xf32>
    %7 = arith.addf %5, %6 : vector<512x128xf32>
    %cst_7 = arith.constant 0.000000e+00 : f32
    %8 = vector.broadcast %cst_7 : f32 to vector<512x128xf32>
    %9 = arith.maximumf %7, %8 : vector<512x128xf32>
    %c0_8 = arith.constant 0 : index
    %c0_9 = arith.constant 0 : index
    %10 = vector.load %arg5[%c0_8, %c0_9] : memref<128x128xbf16, #tpu.memory_space<vmem>>, vector<128x128xbf16>
    %c0_10 = arith.constant 0 : index
    %c0_11 = arith.constant 0 : index
    %11 = vector.load %arg6[%c0_10, %c0_11] : memref<1x128xf32, #tpu.memory_space<vmem>>, vector<1x128xf32>
    %12 = arith.truncf %9 : vector<512x128xf32> to vector<512x128xbf16>
    %cst_12 = arith.constant dense<0.000000e+00> : vector<512x128xf32>
    %13 = tpu.matmul %12, %10, %cst_12 {dimension_numbers = #tpu.dot_dimension_numbers<[1], [0], [0], [1], [0, 0, 1, 1], [], []>} : vector<512x128xbf16>, vector<128x128xbf16>, vector<512x128xf32> -> vector<512x128xf32>
    %14 = vector.broadcast %11 : vector<1x128xf32> to vector<512x128xf32>
    %15 = arith.addf %13, %14 : vector<512x128xf32>
    %cst_13 = arith.constant 0.000000e+00 : f32
    %16 = vector.broadcast %cst_13 : f32 to vector<512x128xf32>
    %17 = arith.maximumf %15, %16 : vector<512x128xf32>
    %c0_14 = arith.constant 0 : index
    %c0_15 = arith.constant 0 : index
    %18 = vector.load %arg7[%c0_14, %c0_15] : memref<128x16xbf16, #tpu.memory_space<vmem>>, vector<128x16xbf16>
    %c0_16 = arith.constant 0 : index
    %c0_17 = arith.constant 0 : index
    %19 = vector.load %arg8[%c0_16, %c0_17] : memref<1x16xf32, #tpu.memory_space<vmem>>, vector<1x16xf32>
    %20 = arith.truncf %17 : vector<512x128xf32> to vector<512x128xbf16>
    %cst_18 = arith.constant dense<0.000000e+00> : vector<512x16xf32>
    %21 = tpu.matmul %20, %18, %cst_18 {dimension_numbers = #tpu.dot_dimension_numbers<[1], [0], [0], [1], [0, 0, 1, 1], [], []>} : vector<512x128xbf16>, vector<128x16xbf16>, vector<512x16xf32> -> vector<512x16xf32>
    %22 = vector.broadcast %19 : vector<1x16xf32> to vector<512x16xf32>
    %23 = arith.addf %21, %22 : vector<512x16xf32>
    %24 = vector.extract_strided_slice %23 {offsets = [0, 0], sizes = [256, 16], strides = [1, 1]} : vector<512x16xf32> to vector<256x16xf32>
    %25 = vector.extract_strided_slice %23 {offsets = [256, 0], sizes = [256, 16], strides = [1, 1]} : vector<512x16xf32> to vector<256x16xf32>
    %26 = arith.subf %25, %24 : vector<256x16xf32>
    %cst_19 = arith.constant 0.000000e+00 : f32
    %27 = vector.broadcast %cst_19 : f32 to vector<256x16xf32>
    %28 = arith.minimumf %26, %27 : vector<256x16xf32>
    %cst_20 = arith.constant dense<0.000000e+00> : vector<256xf32>
    %29 = vector.multi_reduction <add>, %28, %cst_20 [1] : vector<256x16xf32> to vector<256xf32>
    %30 = vector.shape_cast %29 : vector<256xf32> to vector<256x1xf32>
    %c0_21 = arith.constant 0 : index
    %c0_22 = arith.constant 0 : index
    %31 = vector.load %arg9[%c0_21, %c0_22] : memref<256x1xf32, #tpu.memory_space<vmem>>, vector<256x1xf32>
    tpu.vector_store %arg9[%c0_21, %c0_22], %30 {strides = array<i32>} : memref<256x1xf32, #tpu.memory_space<vmem>>, vector<256x1xf32>,
    return
  }
  func.func @transform_0(%arg0: i32) -> (i32, i32) {
    %c0_i32 = arith.constant 0 : i32
    %c0_i32_0 = arith.constant 0 : i32
    return %arg0, %c0_i32 : i32, i32
  }
  func.func @transform_1(%arg0: i32) -> (i32, i32) {
    %c0_i32 = arith.constant 0 : i32
    %c0_i32_0 = arith.constant 0 : i32
    return %arg0, %c0_i32 : i32, i32
  }
  func.func @transform_2(%arg0: i32) -> (i32, i32) {
    %c0_i32 = arith.constant 0 : i32
    %c0_i32_0 = arith.constant 0 : i32
    %c0_i32_1 = arith.constant 0 : i32
    return %c0_i32, %c0_i32_0 : i32, i32
  }
  func.func @transform_3(%arg0: i32) -> (i32, i32) {
    %c0_i32 = arith.constant 0 : i32
    %c0_i32_0 = arith.constant 0 : i32
    %c0_i32_1 = arith.constant 0 : i32
    return %c0_i32, %c0_i32_0 : i32, i32
  }
  func.func @transform_4(%arg0: i32) -> (i32, i32) {
    %c0_i32 = arith.constant 0 : i32
    %c0_i32_0 = arith.constant 0 : i32
    %c0_i32_1 = arith.constant 0 : i32
    return %c0_i32, %c0_i32_0 : i32, i32
  }
  func.func @transform_5(%arg0: i32) -> (i32, i32) {
    %c0_i32 = arith.constant 0 : i32
    %c0_i32_0 = arith.constant 0 : i32
    %c0_i32_1 = arith.constant 0 : i32
    return %c0_i32, %c0_i32_0 : i32, i32
  }
  func.func @transform_6(%arg0: i32) -> (i32, i32) {
    %c0_i32 = arith.constant 0 : i32
    %c0_i32_0 = arith.constant 0 : i32
    %c0_i32_1 = arith.constant 0 : i32
    return %c0_i32, %c0_i32_0 : i32, i32
  }
  func.func @transform_7(%arg0: i32) -> (i32, i32) {
    %c0_i32 = arith.constant 0 : i32
    %c0_i32_0 = arith.constant 0 : i32
    %c0_i32_1 = arith.constant 0 : i32
    return %c0_i32, %c0_i32_0 : i32, i32
  }
  func.func @transform_8(%arg0: i32) -> (i32, i32) {
    %c0_i32 = arith.constant 0 : i32
    %c0_i32_0 = arith.constant 0 : i32
    return %arg0, %c0_i32 : i32, i32
  }
}

</mosaic_0001>

<bundles_post_ra>
// kernel: tpu_custom_call.1
= control target key start
LH: loop header
LB: loop body
LE: loop exit
PB: predicated region body
PF: predicated region fallthrough
CT: control target
= control target key end

     0   :  { %s2149_s27 = smov 0   ;;  %s2737_s0 = inlined_call_operand.vmem [shape: bf16[1024,32], index: 0, kind: input, shape index: {}]   ;;  %s2738_s1 = inlined_call_operand.vmem [shape: bf16[1024,32], index: 1, kind: input, shape index: {}]   ;;  %s2739_s2 = inlined_call_operand.vmem [shape: bf16[32,128], index: 2, kind: input, shape index: {}]   ;;  %s2740_s3 = inlined_call_operand.vmem [shape: f32[1,128], index: 3, kind: input, shape index: {}]   ;;  %s2741_s4 = inlined_call_operand.vmem [shape: bf16[128,128], index: 4, kind: input, shape index: {}]   ;;  %s2742_s5 = inlined_call_operand.vmem [shape: f32[1,128], index: 5, kind: input, shape index: {}]   ;;  %s2743_s6 = inlined_call_operand.vmem [shape: bf16[128,16], index: 6, kind: input, shape index: {}]   ;;  %s2744_s7 = inlined_call_operand.vmem [shape: f32[1,16], index: 7, kind: input, shape index: {}]   ;;  %s2745_s8 = inlined_call_operand.vmem [shape: f32[1024,1], index: 8, kind: output, shape index: {}]  }
   0x1 LB: > { %s1770_s28 = sadd.s32 4294967295, %s2102_s27   ;;  %p1774_p0 = scmp.ge.s32.totalorder %s2102_s27, 1  ;;  %s2102_s27 = sphi %s2149_s27, %s18_s27  }
   0x2   : > { %p274_p1 = scmp.lt.s32.totalorder %s2102_s27, 5 }
   0x4   : > { %p275_p2 = pnand %p1774_p0, %p274_p1 }
   0x5   : > { %s1775_s9 = sshll.u32 (!%p275_p2), %s1770_s28, 5 }
   0x6   : > { %278 = sbr.rel (%p275_p2) target bundleno = 1065 (0x429), region = 52  ;;  %p314_p3 = scmp.lt.s32.totalorder (!%p275_p2), %s1775_s9, 127 }
   0xb   : > { %v2048_v0 = vld [vmem:[%s2739_s2 + $0x8] sm:$0xff]  ;;  %v2047_v1 = vld [vmem:[%s2739_s2] sm:$0xff]  ;;  %s2747_s9 = smov (!%p314_p3, %s1775_s9), 127  ;;  %vm576_vm0 = vcmask 261120   ;;  %v2056_v7 = vld [vmem:[%s2741_s4 + $0x38] sm:$0xff]  ;;  %vm1572_vm1 = vcmask 130048  }
   0xc   : > { %679 = vmatpush.bf16.msra.mxu0 %v2048_v0  ;;  %2065 = vmatpush.bf16.msra.mxu3 %v2048_v0  ;;  %s1776_s12 = sshll.u32 %s2747_s9, 2  ;;  %v2055_v9 = vld [vmem:[%s2741_s4 + $0x30] sm:$0xff]  ;;  %v2054_v10 = vld [vmem:[%s2741_s4 + $0x28] sm:$0xff]  ;;  %v2053_v11 = vld [vmem:[%s2741_s4 + $0x20] sm:$0xff]  ;;  %s1780_s23 = sshll.u32 %s2747_s9, 3  ;;  %vm1669_vm2 = vcmask 7168  }
   0xd   : > { %s2171_s15 = scalar_lea.vmem %s2737_s0, %s1776_s12  ;;  %1006 = vmatpush.bf16.msra.mxu1 %v2056_v7  ;;  %v2052_v12 = vld [vmem:[%s2741_s4 + $0x18] sm:$0xff]  ;;  %v2051_v14 = vld [vmem:[%s2741_s4 + $0x10] sm:$0xff]  ;;  %v2050_v15 = vld [vmem:[%s2741_s4 + $0x8] sm:$0xff]  ;;  %s2303_s14 = scalar_lea.vmem %s2738_s1, %s1776_s12 }
   0xe   : > { %v2015_v2 = vld [vmem:[%s2171_s15] sm:$0xff]  ;;  %v2016_v3 = vld [vmem:[%s2171_s15 + $0x8] sm:$0xff]  ;;  %v2017_v4 = vld [vmem:[%s2171_s15 + $0x10] sm:$0xff]  ;;  %s2603_s26 = scalar_lea.vmem %s2745_s8, %s1780_s23 }
   0xf   : > { %v2018_v5 = vld [vmem:[%s2171_s15 + $0x18] sm:$0xff]  ;;  %v2019_v6 = vld [vmem:[%s2171_s15 + $0x20] sm:$0xff]  ;;  %v2020_v8 = vld [vmem:[%s2171_s15 + $0x28] sm:$0xff] }
  0x10   : > { %680 = vmatpush.bf16.msra.mxu0 %v2047_v1  ;;  %2066 = vmatpush.bf16.msra.mxu3 %v2047_v1  ;;  %v2021_v13 = vld [vmem:[%s2171_s15 + $0x30] sm:$0xff]  ;;  %v2049_v16 = vld [vmem:[%s2741_s4] sm:$0xff]  ;;  %v2022_v17 = vld [vmem:[%s2171_s15 + $0x38] sm:$0xff] }
  0x11   : > { %1007 = vmatpush.bf16.msra.mxu1 %v2055_v9  ;;  %v2023_v18 = vld [vmem:[%s2171_s15 + $0x40] sm:$0xff]  ;;  %v2024_v27 = vld [vmem:[%s2171_s15 + $0x48] sm:$0xff]  ;;  %v2025_v35 = vld [vmem:[%s2171_s15 + $0x50] sm:$0xff] }
  0x12   : > { %v2217_v20 = vld [vmem:[%s2740_s3] ss:$0 sm:$0xff]  ;;  %v2026_v43 = vld [vmem:[%s2171_s15 + $0x58] sm:$0xff]  ;;  %v2028_v59 = vld [vmem:[%s2171_s15 + $0x68] sm:$0xff] }
  0x13   : > { %1917 = vmatmul.msk.bf16.vlgmr.msra.gmra.mxu0 %vm576_vm0, %v2015_v2  ;;  %v2027_v51 = vld [vmem:[%s2171_s15 + $0x60] sm:$0xff]  ;;  %v2245_v0 = vld [vmem:[%s2743_s6 + $0x38] sm:$0xff] }
  0x14   : > { %2067 = vmatpush.bf16.msrb.mxu3 %v2056_v7  ;;  %1339 = vmatpush.bf16.msra.mxu2 %v2245_v0  ;;  %v2258_v7 = vld [vmem:[%s2743_s6 + $0x28] sm:$0xff] }
  0x15   : > { %1008 = vmatpush.bf16.msra.mxu1 %v2054_v10 }
  0x18   : > { %2068 = vmatpush.bf16.msrb.mxu3 %v2055_v9 }
  0x19   : > { %1009 = vmatpush.bf16.msra.mxu1 %v2053_v11 }
  0x1c   : > { %2069 = vmatpush.bf16.msrb.mxu3 %v2054_v10 }
  0x1d   : > { %1010 = vmatpush.bf16.msra.mxu1 %v2052_v12 }
  0x20   : > { %2070 = vmatpush.bf16.msrb.mxu3 %v2053_v11 }
  0x21   : > { %1011 = vmatpush.bf16.msra.mxu1 %v2051_v14 }
  0x23   : > { %1918 = vmatmul.msk.bf16.gmra.mxu0 %vm576_vm0, %v2016_v3 }
  0x24   : > { %2071 = vmatpush.bf16.msrb.mxu3 %v2052_v12  ;;  %v2273_v12 = vld [vmem:[%s2743_s6 + $0x18] sm:$0xff] }
  0x25   : > { %1012 = vmatpush.bf16.msra.mxu1 %v2050_v15 }
  0x28   : > { %2072 = vmatpush.bf16.msrb.mxu3 %v2051_v14 }
  0x29   : > { %1013 = vmatpush.bf16.msra.mxu1 %v2049_v16 }
  0x2c   : > { %2073 = vmatpush.bf16.msrb.mxu3 %v2050_v15 }
  0x30   : > { %2074 = vmatpush.bf16.msrb.mxu3 %v2049_v16  ;;  %v2279_v16 = vld [vmem:[%s2743_s6 + $0x10] sm:$0xff] }
  0x33   : > { %1919 = vmatmul.msk.bf16.gmra.mxu0 %vm576_vm0, %v2017_v4  ;;  %v2251_v4 = vld [vmem:[%s2743_s6 + $0x30] sm:$0xff] }
  0x34   : > { %1340 = vmatpush.bf16.msra.mxu2 %v2251_v4 }
  0x38   : > { %1341 = vmatpush.bf16.msra.mxu2 %v2258_v7 }
  0x43   : > { %1920 = vmatmul.msk.bf16.gmra.mxu0 %vm576_vm0, %v2018_v5  ;;  %v2029_v5 = vld [vmem:[%s2171_s15 + $0x70] sm:$0xff] }
  0x53   : > { %1921 = vmatmul.msk.bf16.gmra.mxu0 %vm576_vm0, %v2019_v6 }
  0x63   : > { %1922 = vmatmul.msk.bf16.gmra.mxu0 %vm576_vm0, %v2020_v8  ;;  %v2265_v8 = vld [vmem:[%s2743_s6 + $0x20] sm:$0xff] }
  0x64   : > { %1342 = vmatpush.bf16.msra.mxu2 %v2265_v8 }
  0x68   : > { %1343 = vmatpush.bf16.msra.mxu2 %v2273_v12 }
  0x6c   : > { %1344 = vmatpush.bf16.msra.mxu2 %v2279_v16 }
  0x73   : > { %1923 = vmatmul.msk.bf16.gmra.mxu0 %vm576_vm0, %v2021_v13 }
  0x83   : > { %1924 = vmatmul.msk.bf16.gmra.mxu0 %vm576_vm0, %v2022_v17  ;;  %v2030_v17 = vld [vmem:[%s2171_s15 + $0x78] sm:$0xff] }
  0x90   : > { %v682_v19 = vpop.f32.mrf.mxu0 }
  0x91   : > { %v683_v21 = vadd.f32 %v2217_v20, %v682_v19  ;;  %v2286_v19 = vld [vmem:[%s2743_s6 + $0x8] sm:$0xff] }
  0x92   : > { %1345 = vmatpush.bf16.msra.mxu2 %v2286_v19 }
  0x93   : > { %1925 = vmatmul.msk.bf16.gmra.mxu0 %vm576_vm0, %v2023_v18  ;;  %v842_v24 = vmax.f32 %v683_v21, 0.0  ;;  %v2293_v21 = vld [vmem:[%s2743_s6] sm:$0xff] }
  0x96   : > { %1346 = vmatpush.bf16.msra.mxu2 %v2293_v21 }
  0x98   : > { %v684_v22 = vpop.f32.mrf.mxu0 }
  0x99   : > { %v685_v23 = vadd.f32 %v2217_v20, %v684_v22 }
  0x9b   : > { %v843_v25 = vmax.f32 %v685_v23, 0.0 }
  0x9d   : > { %v923_v26 = vpack.c.bf16 %v843_v25, %v842_v24 }
  0x9f   : > { %1014 = vmatmul.bf16.vlgmr.msra.gmra.mxu1 %v923_v26 }
  0xa0   : > { %v687_v28 = vpop.f32.mrf.mxu0 }
  0xa1   : > { %v688_v29 = vadd.f32 %v2217_v20, %v687_v28  ;;  %v2031_v28 = vld [vmem:[%s2303_s14] sm:$0xff] }
  0xa3   : > { %1926 = vmatmul.msk.bf16.gmra.mxu0 %vm576_vm0, %v2024_v27  ;;  %v844_v32 = vmax.f32 %v688_v29, 0.0 }
  0xa8   : > { %v689_v30 = vpop.f32.mrf.mxu0 }
  0xa9   : > { %v690_v31 = vadd.f32 %v2217_v20, %v689_v30 }
  0xab   : > { %v845_v33 = vmax.f32 %v690_v31, 0.0 }
  0xad   : > { %v924_v34 = vpack.c.bf16 %v845_v33, %v844_v32 }
  0xaf   : > { %1019 = vmatmul.bf16.gmra.mxu1 %v924_v34 }
  0xb0   : > { %v692_v36 = vpop.f32.mrf.mxu0 }
  0xb1   : > { %v693_v37 = vadd.f32 %v2217_v20, %v692_v36 }
  0xb3   : > { %1927 = vmatmul.msk.bf16.gmra.mxu0 %vm576_vm0, %v2025_v35  ;;  %v846_v40 = vmax.f32 %v693_v37, 0.0  ;;  %v2312_v37 = vld [vmem:[%s2742_s5] ss:$0 sm:$0xff] }
  0xb8   : > { %v694_v38 = vpop.f32.mrf.mxu0 }
  0xb9   : > { %v695_v39 = vadd.f32 %v2217_v20, %v694_v38  ;;  %v2032_v38 = vld [vmem:[%s2303_s14 + $0x8] sm:$0xff] }
  0xbb   : > { %v847_v41 = vmax.f32 %v695_v39, 0.0 }
  0xbd   : > { %v925_v42 = vpack.c.bf16 %v847_v41, %v846_v40 }
  0xbf   : > { %1024 = vmatmul.bf16.gmra.mxu1 %v925_v42 }
  0xc0   : > { %v697_v44 = vpop.f32.mrf.mxu0 }
  0xc1   : > { %v698_v45 = vadd.f32 %v2217_v20, %v697_v44 }
  0xc3   : > { %1928 = vmatmul.msk.bf16.gmra.mxu0 %vm576_vm0, %v2026_v43  ;;  %v848_v48 = vmax.f32 %v698_v45, 0.0 }
  0xc8   : > { %v699_v46 = vpop.f32.mrf.mxu0 }
  0xc9   : > { %v700_v47 = vadd.f32 %v2217_v20, %v699_v46 }
  0xcb   : > { %v849_v49 = vmax.f32 %v700_v47, 0.0 }
  0xcd   : > { %v926_v50 = vpack.c.bf16 %v849_v49, %v848_v48 }
  0xcf   : > { %1029 = vmatmul.bf16.gmra.mxu1 %v926_v50 }
  0xd0   : > { %v702_v52 = vpop.f32.mrf.mxu0 }
  0xd1   : > { %v703_v53 = vadd.f32 %v2217_v20, %v702_v52 }
  0xd3   : > { %1929 = vmatmul.msk.bf16.gmra.mxu0 %vm576_vm0, %v2027_v51  ;;  %v850_v56 = vmax.f32 %v703_v53, 0.0  ;;  %v2033_v53 = vld [vmem:[%s2303_s14 + $0x10] sm:$0xff] }
  0xd8   : > { %v704_v54 = vpop.f32.mrf.mxu0 }
  0xd9   : > { %v705_v55 = vadd.f32 %v2217_v20, %v704_v54 }
  0xdb   : > { %v851_v57 = vmax.f32 %v705_v55, 0.0 }
  0xdd   : > { %v927_v58 = vpack.c.bf16 %v851_v57, %v850_v56 }
  0xdf   : > { %1034 = vmatmul.bf16.gmra.mxu1 %v927_v58 }
  0xe0   : > { %v707_v60 = vpop.f32.mrf.mxu0 }
  0xe1   : > { %v708_v61 = vadd.f32 %v2217_v20, %v707_v60 }
  0xe3   : > { %1930 = vmatmul.msk.bf16.gmra.mxu0 %vm576_vm0, %v2028_v59  ;;  %v852_v1 = vmax.f32 %v708_v61, 0.0 }
  0xe8   : > { %v709_v62 = vpop.f32.mrf.mxu0 }
  0xe9   : > { %v710_v63 = vadd.f32 %v2217_v20, %v709_v62 }
  0xeb   : > { %v853_v2 = vmax.f32 %v710_v63, 0.0 }
  0xed   : > { %v928_v3 = vpack.c.bf16 %v853_v2, %v852_v1 }
  0xef   : > { %1039 = vmatmul.bf16.gmra.mxu1 %v928_v3 }
  0xf0   : > { %v712_v6 = vpop.f32.mrf.mxu0 }
  0xf1   : > { %v713_v9 = vadd.f32 %v2217_v20, %v712_v6  ;;  %v2034_v6 = vld [vmem:[%s2303_s14 + $0x18] sm:$0xff] }
  0xf3   : > { %1931 = vmatmul.msk.bf16.gmra.mxu0 %vm576_vm0, %v2029_v5  ;;  %v854_v13 = vmax.f32 %v713_v9, 0.0 }
  0xf8   : > { %v714_v10 = vpop.f32.mrf.mxu0 }
  0xf9   : > { %v715_v11 = vadd.f32 %v2217_v20, %v714_v10 }
  0xfb   : > { %v855_v14 = vmax.f32 %v715_v11, 0.0 }
  0xfd   : > { %v929_v15 = vpack.c.bf16 %v855_v14, %v854_v13 }
  0xff   : > { %1044 = vmatmul.bf16.gmra.mxu1 %v929_v15 }
 0x100   : > { %v717_v18 = vpop.f32.mrf.mxu0 }
 0x101   : > { %v718_v22 = vadd.f32 %v2217_v20, %v717_v18 }
 0x103   : > { %1932 = vmatmul.msk.bf16.gmra.mxu0 %vm576_vm0, %v2030_v17  ;;  %v856_v25 = vmax.f32 %v718_v22, 0.0 }
 0x108   : > { %v719_v23 = vpop.f32.mrf.mxu0 }
 0x109   : > { %v720_v24 = vadd.f32 %v2217_v20, %v719_v23 }
 0x10b   : > { %v857_v26 = vmax.f32 %v720_v24, 0.0 }
 0x10d   : > { %v930_v27 = vpack.c.bf16 %v857_v26, %v856_v25 }
 0x10f   : > { %1049 = vmatmul.bf16.gmra.mxu1 %v930_v27 }
 0x110   : > { %v722_v29 = vpop.f32.mrf.mxu0 }
 0x111   : > { %v723_v30 = vadd.f32 %v2217_v20, %v722_v29 }
 0x113   : > { %1933 = vmatmul.msk.bf16.gmra.mxu0 %vm576_vm0, %v2031_v28  ;;  %v858_v33 = vmax.f32 %v723_v30, 0.0  ;;  %v2035_v28 = vld [vmem:[%s2303_s14 + $0x20] sm:$0xff] }
 0x118   : > { %v724_v31 = vpop.f32.mrf.mxu0 }
 0x119   : > { %v725_v32 = vadd.f32 %v2217_v20, %v724_v31 }
 0x11b   : > { %v859_v34 = vmax.f32 %v725_v32, 0.0 }
 0x11c   : > { %v1015_v35 = vpop.f32.mrf.mxu1 }
 0x11d   : > { %v931_v36 = vpack.c.bf16 %v859_v34, %v858_v33  ;;  %v1016_v40 = vadd.f32 %v2312_v37, %v1015_v35 }
 0x11f   : > { %1054 = vmatmul.bf16.gmra.mxu1 %v931_v36  ;;  %v1175_v43 = vmax.f32 %v1016_v40, 0.0 }
 0x120   : > { %v727_v39 = vpop.f32.mrf.mxu0 }
 0x121   : > { %v728_v44 = vadd.f32 %v2217_v20, %v727_v39 }
 0x123   : > { %1934 = vmatmul.msk.bf16.gmra.mxu0 %vm576_vm0, %v2032_v38  ;;  %v860_v49 = vmax.f32 %v728_v44, 0.0  ;;  %v2036_v44 = vld [vmem:[%s2303_s14 + $0x28] sm:$0xff] }
 0x124   : > { %v1017_v41 = vpop.f32.mrf.mxu1 }
 0x125   : > { %v1018_v42 = vadd.f32 %v2312_v37, %v1017_v41 }
 0x127   : > { %v1176_v45 = vmax.f32 %v1018_v42, 0.0 }
 0x128   : > { %v729_v46 = vpop.f32.mrf.mxu0 }
 0x129   : > { %v730_v47 = vadd.f32 %v2217_v20, %v729_v46  ;;  %v1256_v48 = vpack.c.bf16 %v1176_v45, %v1175_v43 }
 0x12b   : > { %v861_v50 = vmax.f32 %v730_v47, 0.0  ;;  %1347 = vmatmul.bf16.vlgmr.msra.gmra.mxu2 %v1256_v48 }
 0x12c   : > { %v1020_v51 = vpop.f32.mrf.mxu1 }
 0x12d   : > { %v932_v52 = vpack.c.bf16 %v861_v50, %v860_v49  ;;  %v1021_v55 = vadd.f32 %v2312_v37, %v1020_v51 }
 0x12f   : > { %1059 = vmatmul.bf16.gmra.mxu1 %v932_v52  ;;  %v1177_v58 = vmax.f32 %v1021_v55, 0.0 }
 0x130   : > { %v732_v54 = vpop.f32.mrf.mxu0 }
 0x131   : > { %v733_v59 = vadd.f32 %v2217_v20, %v732_v54 }
 0x133   : > { %1935 = vmatmul.msk.bf16.gmra.mxu0 %vm576_vm0, %v2033_v53  ;;  %v862_v1 = vmax.f32 %v733_v59, 0.0  ;;  %v2037_v59 = vld [vmem:[%s2303_s14 + $0x30] sm:$0xff] }
 0x134   : > { %v1022_v56 = vpop.f32.mrf.mxu1 }
 0x135   : > { %v1023_v57 = vadd.f32 %v2312_v37, %v1022_v56 }
 0x137   : > { %v1178_v60 = vmax.f32 %v1023_v57, 0.0 }
 0x138   : > { %v734_v61 = vpop.f32.mrf.mxu0 }
 0x139   : > { %v735_v62 = vadd.f32 %v2217_v20, %v734_v61  ;;  %v1257_v63 = vpack.c.bf16 %v1178_v60, %v1177_v58 }
 0x13b   : > { %v863_v2 = vmax.f32 %v735_v62, 0.0  ;;  %1352 = vmatmul.bf16.gmra.mxu2 %v1257_v63  ;;  %v2040_v62 = vld [vmem:[%s2303_s14 + $0x48] sm:$0xff] }
 0x13c   : > { %v1025_v3 = vpop.f32.mrf.mxu1  ;;  %1942 = vmatmul.msk.bf16.vlgmr.msra.gmra.mxu3 %vm576_vm0, %v2040_v62 }
 0x13d   : > { %v933_v5 = vpack.c.bf16 %v863_v2, %v862_v1  ;;  %v1026_v10 = vadd.f32 %v2312_v37, %v1025_v3  ;;  %2075 = vmatpush.bf16.msra.mxu3 %v2245_v0  ;;  %v2038_v0 = vld [vmem:[%s2303_s14 + $0x38] sm:$0xff] }
 0x13f   : > { %1064 = vmatmul.bf16.gmra.mxu1 %v933_v5  ;;  %v1179_v14 = vmax.f32 %v1026_v10, 0.0 }
 0x140   : > { %v737_v9 = vpop.f32.mrf.mxu0 }
 0x141   : > { %v738_v15 = vadd.f32 %v2217_v20, %v737_v9  ;;  %2076 = vmatpush.bf16.msra.mxu3 %v2251_v4 }
 0x143   : > { %1936 = vmatmul.msk.bf16.gmra.mxu0 %vm576_vm0, %v2034_v6  ;;  %v864_v24 = vmax.f32 %v738_v15, 0.0 }
 0x144   : > { %v1027_v11 = vpop.f32.mrf.mxu1 }
 0x145   : > { %v1028_v13 = vadd.f32 %v2312_v37, %v1027_v11  ;;  %2077 = vmatpush.bf16.msra.mxu3 %v2258_v7 }
 0x147   : > { %v1180_v17 = vmax.f32 %v1028_v13, 0.0 }
 0x148   : > { %v739_v18 = vpop.f32.mrf.mxu0 }
 0x149   : > { %v740_v22 = vadd.f32 %v2217_v20, %v739_v18  ;;  %v1258_v23 = vpack.c.bf16 %v1180_v17, %v1179_v14  ;;  %2078 = vmatpush.bf16.msra.mxu3 %v2265_v8 }
 0x14b   : > { %v865_v25 = vmax.f32 %v740_v22, 0.0  ;;  %1357 = vmatmul.bf16.gmra.mxu2 %v1258_v23  ;;  %v2041_v22 = vld [vmem:[%s2303_s14 + $0x50] sm:$0xff] }
 0x14c   : > { %v1030_v26 = vpop.f32.mrf.mxu1  ;;  %1943 = vmatmul.msk.bf16.gmra.mxu3 %vm576_vm0, %v2041_v22 }
 0x14d   : > { %v934_v27 = vpack.c.bf16 %v865_v25, %v864_v24  ;;  %v1031_v30 = vadd.f32 %v2312_v37, %v1030_v26  ;;  %2079 = vmatpush.bf16.msra.mxu3 %v2273_v12  ;;  %v2039_v12 = vld [vmem:[%s2303_s14 + $0x40] sm:$0xff] }
 0x14f   : > { %1069 = vmatmul.bf16.gmra.mxu1 %v934_v27  ;;  %v1181_v33 = vmax.f32 %v1031_v30, 0.0 }
 0x150   : > { %v742_v29 = vpop.f32.mrf.mxu0 }
 0x151   : > { %v743_v34 = vadd.f32 %v2217_v20, %v742_v29  ;;  %2080 = vmatpush.bf16.msra.mxu3 %v2279_v16 }
 0x153   : > { %1937 = vmatmul.msk.bf16.gmra.mxu0 %vm576_vm0, %v2035_v28  ;;  %v866_v40 = vmax.f32 %v743_v34, 0.0  ;;  %v2042_v34 = vld [vmem:[%s2303_s14 + $0x58] sm:$0xff] }
 0x154   : > { %v1032_v31 = vpop.f32.mrf.mxu1 }
 0x155   : > { %v1033_v32 = vadd.f32 %v2312_v37, %v1032_v31  ;;  %2081 = vmatpush.bf16.msra.mxu3 %v2286_v19 }
 0x157   : > { %v1182_v35 = vmax.f32 %v1033_v32, 0.0 }
 0x158   : > { %v744_v36 = vpop.f32.mrf.mxu0 }
 0x159   : > { %v745_v38 = vadd.f32 %v2217_v20, %v744_v36  ;;  %v1259_v39 = vpack.c.bf16 %v1182_v35, %v1181_v33  ;;  %2082 = vmatpush.bf16.msra.mxu3 %v2293_v21 }
 0x15b   : > { %v867_v41 = vmax.f32 %v745_v38, 0.0  ;;  %1362 = vmatmul.bf16.gmra.mxu2 %v1259_v39 }
 0x15c   : > { %v1035_v42 = vpop.f32.mrf.mxu1  ;;  %1944 = vmatmul.msk.bf16.gmra.mxu3 %vm576_vm0, %v2042_v34 }
 0x15d   : > { %v935_v43 = vpack.c.bf16 %v867_v41, %v866_v40  ;;  %v1036_v46 = vadd.f32 %v2312_v37, %v1035_v42 }
 0x15f   : > { %1074 = vmatmul.bf16.gmra.mxu1 %v935_v43  ;;  %v1183_v49 = vmax.f32 %v1036_v46, 0.0 }
 0x160   : > { %v747_v45 = vpop.f32.mrf.mxu0 }
 0x161   : > { %v748_v50 = vadd.f32 %v2217_v20, %v747_v45 }
 0x163   : > { %1938 = vmatmul.msk.bf16.gmra.mxu0 %vm576_vm0, %v2036_v44  ;;  %v868_v55 = vmax.f32 %v748_v50, 0.0 }
 0x164   : > { %v1037_v47 = vpop.f32.mrf.mxu1 }
 0x165   : > { %v1038_v48 = vadd.f32 %v2312_v37, %v1037_v47  ;;  %v2043_v47 = vld [vmem:[%s2303_s14 + $0x60] sm:$0xff] }
 0x167   : > { %v1184_v51 = vmax.f32 %v1038_v48, 0.0 }
 0x168   : > { %v749_v52 = vpop.f32.mrf.mxu0 }
 0x169   : > { %v750_v53 = vadd.f32 %v2217_v20, %v749_v52  ;;  %v1260_v54 = vpack.c.bf16 %v1184_v51, %v1183_v49 }
 0x16b   : > { %v869_v56 = vmax.f32 %v750_v53, 0.0  ;;  %1367 = vmatmul.bf16.gmra.mxu2 %v1260_v54 }
 0x16c   : > { %v1040_v57 = vpop.f32.mrf.mxu1  ;;  %1945 = vmatmul.msk.bf16.gmra.mxu3 %vm576_vm0, %v2043_v47 }
 0x16d   : > { %v936_v58 = vpack.c.bf16 %v869_v56, %v868_v55  ;;  %v1041_v61 = vadd.f32 %v2312_v37, %v1040_v57 }
 0x16f   : > { %1079 = vmatmul.bf16.gmra.mxu1 %v936_v58  ;;  %v1185_v2 = vmax.f32 %v1041_v61, 0.0 }
 0x170   : > { %v752_v60 = vpop.f32.mrf.mxu0 }
 0x171   : > { %v753_v3 = vadd.f32 %v2217_v20, %v752_v60 }
 0x173   : > { %1939 = vmatmul.msk.bf16.gmra.mxu0 %vm576_vm0, %v2037_v59  ;;  %v870_v11 = vmax.f32 %v753_v3, 0.0 }
 0x174   : > { %v1042_v63 = vpop.f32.mrf.mxu1 }
 0x175   : > { %v1043_v1 = vadd.f32 %v2312_v37, %v1042_v63  ;;  %v2044_v63 = vld [vmem:[%s2303_s14 + $0x68] sm:$0xff] }
 0x177   : > { %v1186_v5 = vmax.f32 %v1043_v1, 0.0 }
 0x178   : > { %v754_v6 = vpop.f32.mrf.mxu0 }
 0x179   : > { %v755_v9 = vadd.f32 %v2217_v20, %v754_v6  ;;  %v1261_v10 = vpack.c.bf16 %v1186_v5, %v1185_v2 }
 0x17b   : > { %v871_v13 = vmax.f32 %v755_v9, 0.0  ;;  %1372 = vmatmul.bf16.gmra.mxu2 %v1261_v10 }
 0x17c   : > { %v1045_v14 = vpop.f32.mrf.mxu1  ;;  %1946 = vmatmul.msk.bf16.gmra.mxu3 %vm576_vm0, %v2044_v63 }
 0x17d   : > { %v937_v15 = vpack.c.bf16 %v871_v13, %v870_v11  ;;  %v1046_v18 = vadd.f32 %v2312_v37, %v1045_v14 }
 0x17f   : > { %1084 = vmatmul.bf16.gmra.mxu1 %v937_v15  ;;  %v1187_v24 = vmax.f32 %v1046_v18, 0.0 }
 0x180   : > { %v757_v17 = vpop.f32.mrf.mxu0 }
 0x181   : > { %v758_v7 = vadd.f32 %v2217_v20, %v757_v17 }
 0x183   : > { %1940 = vmatmul.msk.bf16.gmra.mxu0 %vm576_vm0, %v2038_v0  ;;  %v872_v28 = vmax.f32 %v758_v7, 0.0 }
 0x184   : > { %v1047_v23 = vpop.f32.mrf.mxu1 }
 0x185   : > { %v1048_v4 = vadd.f32 %v2312_v37, %v1047_v23 }
 0x187   : > { %v1188_v25 = vmax.f32 %v1048_v4, 0.0  ;;  %v2045_v4 = vld [vmem:[%s2303_s14 + $0x70] sm:$0xff] }
 0x188   : > { %v759_v26 = vpop.f32.mrf.mxu0 }
 0x189   : > { %v760_v8 = vadd.f32 %v2217_v20, %v759_v26  ;;  %v1262_v27 = vpack.c.bf16 %v1188_v25, %v1187_v24 }
 0x18b   : > { %v873_v29 = vmax.f32 %v760_v8, 0.0  ;;  %1377 = vmatmul.bf16.gmra.mxu2 %v1262_v27 }
 0x18c   : > { %v1050_v30 = vpop.f32.mrf.mxu1  ;;  %1947 = vmatmul.msk.bf16.gmra.mxu3 %vm576_vm0, %v2045_v4 }
 0x18d   : > { %v938_v31 = vpack.c.bf16 %v873_v29, %v872_v28  ;;  %v1051_v33 = vadd.f32 %v2312_v37, %v1050_v30 }
 0x18f   : > { %1089 = vmatmul.bf16.gmra.mxu1 %v938_v31  ;;  %v1189_v36 = vmax.f32 %v1051_v33, 0.0 }
 0x190   : > { %v762_v32 = vpop.f32.mrf.mxu0 }
 0x191   : > { %v763_v38 = vadd.f32 %v2217_v20, %v762_v32 }
 0x193   : > { %1941 = vmatmul.msk.bf16.gmra.mxu0 %vm576_vm0, %v2039_v12  ;;  %v874_v21 = vmax.f32 %v763_v38, 0.0 }
 0x194   : > { %v1052_v35 = vpop.f32.mrf.mxu1 }
 0x195   : > { %v1053_v16 = vadd.f32 %v2312_v37, %v1052_v35 }
 0x197   : > { %v1190_v19 = vmax.f32 %v1053_v16, 0.0 }
 0x198   : > { %v764_v39 = vpop.f32.mrf.mxu0 }
 0x199   : > { %v765_v40 = vadd.f32 %v2217_v20, %v764_v39  ;;  %v1263_v41 = vpack.c.bf16 %v1190_v19, %v1189_v36  ;;  %v2046_v36 = vld [vmem:[%s2303_s14 + $0x78] sm:$0xff] }
 0x19b   : > { %v875_v42 = vmax.f32 %v765_v40, 0.0  ;;  %1382 = vmatmul.bf16.gmra.mxu2 %v1263_v41 }
 0x19c   : > { %v1055_v43 = vpop.f32.mrf.mxu1  ;;  %1948 = vmatmul.msk.bf16.gmra.mxu3 %vm576_vm0, %v2046_v36 }
 0x19d   : > { %v939_v44 = vpack.c.bf16 %v875_v42, %v874_v21  ;;  %v1056_v46 = vadd.f32 %v2312_v37, %v1055_v43 }
 0x19f   : > { %1094 = vmatmul.bf16.gmra.mxu1 %v939_v44  ;;  %v1191_v50 = vmax.f32 %v1056_v46, 0.0 }
 0x1a0   : > { %v767_v45 = vpop.f32.mrf.mxu0 }
 0x1a1   : > { %v768_v51 = vadd.f32 %v2217_v20, %v767_v45 }
 0x1a3   : > { %v876_v56 = vmax.f32 %v768_v51, 0.0 }
 0x1a4   : > { %v1057_v48 = vpop.f32.mrf.mxu1 }
 0x1a5   : > { %v1058_v49 = vadd.f32 %v2312_v37, %v1057_v48 }
 0x1a7   : > { %v1192_v52 = vmax.f32 %v1058_v49, 0.0 }
 0x1a8   : > { %v769_v53 = vpop.f32.mrf.mxu0 }
 0x1a9   : > { %v770_v54 = vadd.f32 %v2217_v20, %v769_v53  ;;  %v1264_v55 = vpack.c.bf16 %v1192_v52, %v1191_v50 }
 0x1ab   : > { %v877_v57 = vmax.f32 %v770_v54, 0.0  ;;  %1387 = vmatmul.bf16.gmra.mxu2 %v1264_v55 }
 0x1ac   : > { %v1060_v58 = vpop.f32.mrf.mxu1 }
 0x1ad   : > { %v940_v59 = vpack.c.bf16 %v877_v57, %v876_v56  ;;  %v1061_v62 = vadd.f32 %v2312_v37, %v1060_v58 }
 0x1ae   : > { %v2382_v60 = vpop.f32.mrf.mxu2 }
 0x1af   : > { %1099 = vmatmul.bf16.gmra.mxu1 %v940_v59  ;;  %v1193_v5 = vmax.f32 %v1061_v62, 0.0 }
 0x1b0   : > { %v772_v61 = vpop.f32.mrf.mxu0 }
 0x1b1   : > { %v773_v6 = vadd.f32 %v2217_v20, %v772_v61 }
 0x1b3   : > { %v878_v14 = vmax.f32 %v773_v6, 0.0 }
 0x1b4   : > { %v1062_v1 = vpop.f32.mrf.mxu1 }
 0x1b5   : > { %v1063_v2 = vadd.f32 %v2312_v37, %v1062_v1 }
 0x1b6   : > { %v2388_v3 = vpop.f32.mrf.mxu2 }
 0x1b7   : > { %v1194_v9 = vmax.f32 %v1063_v2, 0.0 }
 0x1b8   : > { %v774_v10 = vpop.f32.mrf.mxu0 }
 0x1b9   : > { %v775_v11 = vadd.f32 %v2217_v20, %v774_v10  ;;  %v1265_v13 = vpack.c.bf16 %v1194_v9, %v1193_v5 }
 0x1bb   : > { %v879_v15 = vmax.f32 %v775_v11, 0.0  ;;  %1392 = vmatmul.bf16.gmra.mxu2 %v1265_v13 }
 0x1bc   : > { %v1065_v0 = vpop.f32.mrf.mxu1 }
 0x1bd   : > { %v941_v17 = vpack.c.bf16 %v879_v15, %v878_v14  ;;  %v1066_v23 = vadd.f32 %v2312_v37, %v1065_v0 }
 0x1be   : > { %v2392_v18 = vpop.f32.mrf.mxu2 }
 0x1bf   : > { %1104 = vmatmul.bf16.gmra.mxu1 %v941_v17  ;;  %v1195_v26 = vmax.f32 %v1066_v23, 0.0 }
 0x1c0   : > { %v777_v22 = vpop.f32.mrf.mxu0 }
 0x1c1   : > { %v778_v8 = vadd.f32 %v2217_v20, %v777_v22 }
 0x1c3   : > { %v880_v31 = vmax.f32 %v778_v8, 0.0 }
 0x1c4   : > { %v1067_v24 = vpop.f32.mrf.mxu1 }
 0x1c5   : > { %v1068_v7 = vadd.f32 %v2312_v37, %v1067_v24 }
 0x1c6   : > { %v2398_v25 = vpop.f32.mrf.mxu2 }
 0x1c7   : > { %v1196_v27 = vmax.f32 %v1068_v7, 0.0 }
 0x1c8   : > { %v779_v28 = vpop.f32.mrf.mxu0 }
 0x1c9   : > { %v780_v29 = vadd.f32 %v2217_v20, %v779_v28  ;;  %v1266_v30 = vpack.c.bf16 %v1196_v27, %v1195_v26  ;;  %v807_v28 = vpop.f32.mrf.mxu3 }
 0x1cb   : > { %v881_v12 = vmax.f32 %v780_v29, 0.0  ;;  %1397 = vmatmul.bf16.gmra.mxu2 %v1266_v30 }
 0x1cc   : > { %v1070_v32 = vpop.f32.mrf.mxu1 }
 0x1cd   : > { %v942_v33 = vpack.c.bf16 %v881_v12, %v880_v31  ;;  %v1071_v16 = vadd.f32 %v2312_v37, %v1070_v32 }
 0x1ce   : > { %v2402_v34 = vpop.f32.mrf.mxu2 }
 0x1cf   : > { %1109 = vmatmul.bf16.gmra.mxu1 %v942_v33  ;;  %v1197_v40 = vmax.f32 %v1071_v16, 0.0 }
 0x1d0   : > { %v782_v35 = vpop.f32.mrf.mxu0 }
 0x1d1   : > { %v783_v41 = vadd.f32 %v2217_v20, %v782_v35 }
 0x1d3   : > { %v882_v45 = vmax.f32 %v783_v41, 0.0 }
 0x1d4   : > { %v1072_v38 = vpop.f32.mrf.mxu1 }
 0x1d5   : > { %v1073_v19 = vadd.f32 %v2312_v37, %v1072_v38 }
 0x1d6   : > { %v2408_v39 = vpop.f32.mrf.mxu2 }
 0x1d7   : > { %v1198_v21 = vmax.f32 %v1073_v19, 0.0  ;;  %v809_v19 = vpop.f32.mrf.mxu3 }
 0x1d8   : > { %v784_v42 = vpop.f32.mrf.mxu0 }
 0x1d9   : > { %v785_v43 = vadd.f32 %v2217_v20, %v784_v42  ;;  %v1267_v44 = vpack.c.bf16 %v1198_v21, %v1197_v40 }
 0x1db   : > { %v883_v46 = vmax.f32 %v785_v43, 0.0  ;;  %1402 = vmatmul.bf16.gmra.mxu2 %v1267_v44 }
 0x1dc   : > { %v1075_v47 = vpop.f32.mrf.mxu1 }
 0x1dd   : > { %v943_v48 = vpack.c.bf16 %v883_v46, %v882_v45  ;;  %v1076_v51 = vadd.f32 %v2312_v37, %v1075_v47 }
 0x1de   : > { %v2412_v49 = vpop.f32.mrf.mxu2 }
 0x1df   : > { %1114 = vmatmul.bf16.gmra.mxu1 %v943_v48  ;;  %v1199_v55 = vmax.f32 %v1076_v51, 0.0  ;;  %v812_v47 = vpop.f32.mrf.mxu3 }
 0x1e0   : > { %v787_v50 = vpop.f32.mrf.mxu0 }
 0x1e1   : > { %v788_v56 = vadd.f32 %v2217_v20, %v787_v50 }
 0x1e3   : > { %v884_v62 = vmax.f32 %v788_v56, 0.0 }
 0x1e4   : > { %v1077_v52 = vpop.f32.mrf.mxu1 }
 0x1e5   : > { %v1078_v53 = vadd.f32 %v2312_v37, %v1077_v52 }
 0x1e6   : > { %v2416_v54 = vpop.f32.mrf.mxu2 }
 0x1e7   : > { %v1200_v57 = vmax.f32 %v1078_v53, 0.0 }
 0x1e8   : > { %v789_v58 = vpop.f32.mrf.mxu0 }
 0x1e9   : > { %v1268_v59 = vpack.c.bf16 %v1200_v57, %v1199_v55  ;;  %v790_v61 = vadd.f32 %v2217_v20, %v789_v58 }
 0x1eb   : > { %v885_v63 = vmax.f32 %v790_v61, 0.0  ;;  %1407 = vmatmul.bf16.gmra.mxu2 %v1268_v59 }
 0x1ec   : > { %v1080_v1 = vpop.f32.mrf.mxu1 }
 0x1ed   : > { %v944_v2 = vpack.c.bf16 %v885_v63, %v884_v62  ;;  %v1081_v9 = vadd.f32 %v2312_v37, %v1080_v1  ;;  %v814_v1 = vpop.f32.mrf.mxu3 }
 0x1ee   : > { %v2420_v5 = vpop.f32.mrf.mxu2 }
 0x1ef   : > { %1119 = vmatmul.bf16.gmra.mxu1 %v944_v2  ;;  %v1201_v14 = vmax.f32 %v1081_v9, 0.0  ;;  %v808_v9 = vadd.f32 %v2217_v20, %v807_v28 }
 0x1f0   : > { %v792_v6 = vpop.f32.mrf.mxu0 }
 0x1f1   : > { %v793_v15 = vadd.f32 %v2217_v20, %v792_v6 }
 0x1f3   : > { %v886_v4 = vmax.f32 %v793_v15, 0.0 }
 0x1f4   : > { %v1082_v10 = vpop.f32.mrf.mxu1 }
 0x1f5   : > { %v1083_v11 = vadd.f32 %v2312_v37, %v1082_v10  ;;  %v810_v10 = vadd.f32 %v2217_v20, %v809_v19 }
 0x1f6   : > { %v2424_v13 = vpop.f32.mrf.mxu2 }
 0x1f7   : > { %v1202_v0 = vmax.f32 %v1083_v11, 0.0 }
 0x1f8   : > { %v794_v17 = vpop.f32.mrf.mxu0 }
 0x1f9   : > { %v1269_v22 = vpack.c.bf16 %v1202_v0, %v1201_v14  ;;  %v795_v23 = vadd.f32 %v2217_v20, %v794_v17  ;;  %v817_v17 = vpop.f32.mrf.mxu3 }
 0x1fb   : > { %v887_v24 = vmax.f32 %v795_v23, 0.0  ;;  %1412 = vmatmul.bf16.gmra.mxu2 %v1269_v22  ;;  %v892_v22 = vmax.f32 %v808_v9, 0.0  ;;  %v893_v23 = vmax.f32 %v810_v10, 0.0 }
 0x1fc   : > { %v1085_v7 = vpop.f32.mrf.mxu1 }
 0x1fd   : > { %v945_v26 = vpack.c.bf16 %v887_v24, %v886_v4  ;;  %v1086_v29 = vadd.f32 %v2312_v37, %v1085_v7  ;;  %v948_v7 = vpack.c.bf16 %v893_v23, %v892_v22 }
 0x1fe   : > { %v2428_v8 = vpop.f32.mrf.mxu2 }
 0x1ff   : > { %1124 = vmatmul.bf16.gmra.mxu1 %v945_v26  ;;  %v1203_v32 = vmax.f32 %v1086_v29, 0.0 }
 0x200   : > { %v797_v27 = vpop.f32.mrf.mxu0 }
 0x201   : > { %v798_v33 = vadd.f32 %v2217_v20, %v797_v27  ;;  %v819_v27 = vpop.f32.mrf.mxu3 }
 0x203   : > { %v888_v40 = vmax.f32 %v798_v33, 0.0 }
 0x204   : > { %v1087_v30 = vpop.f32.mrf.mxu1 }
 0x205   : > { %v1088_v31 = vadd.f32 %v2312_v37, %v1087_v30  ;;  %v813_v30 = vadd.f32 %v2217_v20, %v812_v47  ;;  %v820_v47 = vadd.f32 %v2217_v20, %v819_v27 }
 0x206   : > { %v2432_v12 = vpop.f32.mrf.mxu2 }
 0x207   : > { %v1204_v35 = vmax.f32 %v1088_v31, 0.0  ;;  %v815_v31 = vadd.f32 %v2217_v20, %v814_v1 }
 0x208   : > { %v799_v16 = vpop.f32.mrf.mxu0 }
 0x209   : > { %v1270_v36 = vpack.c.bf16 %v1204_v35, %v1203_v32  ;;  %v800_v38 = vadd.f32 %v2217_v20, %v799_v16 }
 0x20b   : > { %v889_v41 = vmax.f32 %v800_v38, 0.0  ;;  %1417 = vmatmul.bf16.gmra.mxu2 %v1270_v36  ;;  %v894_v36 = vmax.f32 %v813_v30, 0.0  ;;  %v895_v38 = vmax.f32 %v815_v31, 0.0 }
 0x20c   : > { %v1090_v21 = vpop.f32.mrf.mxu1 }
 0x20d   : > { %v946_v42 = vpack.c.bf16 %v889_v41, %v888_v40  ;;  %v1091_v45 = vadd.f32 %v2312_v37, %v1090_v21  ;;  %v822_v41 = vpop.f32.mrf.mxu3  ;;  %v949_v21 = vpack.c.bf16 %v895_v38, %v894_v36 }
 0x20e   : > { %v2436_v43 = vpop.f32.mrf.mxu2  ;;  %v823_v9 = vadd.f32 %v2217_v20, %v822_v41 }
 0x20f   : > { %1129 = vmatmul.bf16.gmra.mxu1 %v946_v42  ;;  %v1205_v51 = vmax.f32 %v1091_v45, 0.0 }
 0x210   : > { %v802_v44 = vpop.f32.mrf.mxu0  ;;  %v898_v22 = vmax.f32 %v823_v9, 0.0 }
 0x211   : > { %v803_v52 = vadd.f32 %v2217_v20, %v802_v44 }
 0x213   : > { %v890_v58 = vmax.f32 %v803_v52, 0.0 }
 0x214   : > { %v1092_v46 = vpop.f32.mrf.mxu1 }
 0x215   : > { %v1093_v48 = vadd.f32 %v2312_v37, %v1092_v46  ;;  %v818_v46 = vadd.f32 %v2217_v20, %v817_v17  ;;  %v824_v52 = vpop.f32.mrf.mxu3 }
 0x216   : > { %v2440_v50 = vpop.f32.mrf.mxu2  ;;  %v825_v10 = vadd.f32 %v2217_v20, %v824_v52 }
 0x217   : > { %v1206_v53 = vmax.f32 %v1093_v48, 0.0 }
 0x218   : > { %v804_v55 = vpop.f32.mrf.mxu0  ;;  %v899_v23 = vmax.f32 %v825_v10, 0.0 }
 0x219   : > { %v1271_v56 = vpack.c.bf16 %v1206_v53, %v1205_v51  ;;  %v805_v57 = vadd.f32 %v2217_v20, %v804_v55 }
 0x21a   : > { %v951_v27 = vpack.c.bf16 %v899_v23, %v898_v22 }
 0x21b   : > { %v891_v59 = vmax.f32 %v805_v57, 0.0  ;;  %1422 = vmatmul.bf16.gmra.mxu2 %v1271_v56  ;;  %v896_v56 = vmax.f32 %v818_v46, 0.0  ;;  %v897_v57 = vmax.f32 %v820_v47, 0.0 }
 0x21c   : > { %v1095_v61 = vpop.f32.mrf.mxu1 }
 0x21d   : > { %v947_v62 = vpack.c.bf16 %v891_v59, %v890_v58  ;;  %v1096_v2 = vadd.f32 %v2312_v37, %v1095_v61  ;;  %v950_v61 = vpack.c.bf16 %v897_v57, %v896_v56  ;;  %v827_v1 = vpop.f32.mrf.mxu3 }
 0x21e   : > { %v2444_v63 = vpop.f32.mrf.mxu2 }
 0x21f   : > { %1134 = vmatmul.bf16.vlgmr.msrb.gmra.mxu3 %v947_v62  ;;  %v1207_v15 = vmax.f32 %v1096_v2, 0.0 }
 0x224   : > { %v1097_v6 = vpop.f32.mrf.mxu1 }
 0x225   : > { %v1098_v11 = vadd.f32 %v2312_v37, %v1097_v6 }
 0x226   : > { %v2450_v14 = vpop.f32.mrf.mxu2 }
 0x227   : > { %v1208_v0 = vmax.f32 %v1098_v11, 0.0 }
 0x229   : > { %v1272_v4 = vpack.c.bf16 %v1208_v0, %v1207_v15 }
 0x22b   : > { %1427 = vmatmul.bf16.gmra.mxu2 %v1272_v4 }
 0x22c   : > { %v1100_v24 = vpop.f32.mrf.mxu1 }
 0x22d   : > { %v1101_v28 = vadd.f32 %v2312_v37, %v1100_v24  ;;  %v829_v24 = vpop.f32.mrf.mxu3 }
 0x22e   : > { %v2452_v26 = vpop.f32.mrf.mxu2 }
 0x22f   : > { %1139 = vmatmul.bf16.gmra.mxu3 %v948_v7  ;;  %v1209_v35 = vmax.f32 %v1101_v28, 0.0 }
 0x234   : > { %v1102_v29 = vpop.f32.mrf.mxu1 }
 0x235   : > { %v1103_v32 = vadd.f32 %v2312_v37, %v1102_v29  ;;  %v832_v31 = vpop.f32.mrf.mxu3 }
 0x236   : > { %v2458_v33 = vpop.f32.mrf.mxu2 }
 0x237   : > { %v1210_v16 = vmax.f32 %v1103_v32, 0.0  ;;  %v828_v32 = vadd.f32 %v2217_v20, %v827_v1 }
 0x239   : > { %v1273_v19 = vpack.c.bf16 %v1210_v16, %v1209_v35  ;;  %v830_v35 = vadd.f32 %v2217_v20, %v829_v24 }
 0x23b   : > { %1432 = vmatmul.bf16.gmra.mxu2 %v1273_v19  ;;  %v901_v41 = vmax.f32 %v830_v35, 0.0 }
 0x23c   : > { %v1105_v40 = vpop.f32.mrf.mxu1 }
 0x23d   : > { %v1106_v44 = vadd.f32 %v2312_v37, %v1105_v40  ;;  %v900_v40 = vmax.f32 %v828_v32, 0.0  ;;  %v834_v47 = vpop.f32.mrf.mxu3 }
 0x23e   : > { %v2460_v42 = vpop.f32.mrf.mxu2 }
 0x23f   : > { %1144 = vmatmul.bf16.gmra.mxu3 %v949_v21  ;;  %v1211_v53 = vmax.f32 %v1106_v44, 0.0 }
 0x244   : > { %v1107_v45 = vpop.f32.mrf.mxu1 }
 0x245   : > { %v1108_v48 = vadd.f32 %v2312_v37, %v1107_v45  ;;  %v952_v45 = vpack.c.bf16 %v901_v41, %v900_v40  ;;  %v837_v1 = vpop.f32.mrf.mxu3 }
 0x246   : > { %v2466_v51 = vpop.f32.mrf.mxu2 }
 0x247   : > { %v1212_v55 = vmax.f32 %v1108_v48, 0.0 }
 0x249   : > { %v1274_v58 = vpack.c.bf16 %v1212_v55, %v1211_v53  ;;  %v833_v53 = vadd.f32 %v2217_v20, %v832_v31  ;;  %v2094_v55 = vld [vmem:[%s2740_s3] ss:$0 sm:$0xff] }
 0x24a   : > { %v835_v56 = vadd.f32 %v2094_v55, %v834_v47  ;;  %v838_v23 = vadd.f32 %v2094_v55, %v837_v1 }
 0x24b   : > { %1437 = vmatmul.bf16.gmra.mxu2 %v1274_v58 }
 0x24c   : > { %v1110_v59 = vpop.f32.mrf.mxu1 }
 0x24d   : > { %v1111_v2 = vadd.f32 %v2312_v37, %v1110_v59  ;;  %v839_v20 = vpop.f32.mrf.mxu3 }
 0x24e   : > { %v2468_v62 = vpop.f32.mrf.mxu2 }
 0x24f   : > { %1149 = vmatmul.bf16.gmra.mxu3 %v950_v61  ;;  %v1213_v0 = vmax.f32 %v1111_v2, 0.0  ;;  %v902_v2 = vmax.f32 %v833_v53, 0.0 }
 0x254   : > { %v1112_v6 = vpop.f32.mrf.mxu1 }
 0x255   : > { %v1113_v11 = vadd.f32 %v2312_v37, %v1112_v6  ;;  %v903_v6 = vmax.f32 %v835_v56, 0.0 }
 0x256   : > { %v2474_v15 = vpop.f32.mrf.mxu2 }
 0x257   : > { %v1214_v17 = vmax.f32 %v1113_v11, 0.0  ;;  %v953_v11 = vpack.c.bf16 %v903_v6, %v902_v2 }
 0x259   : > { %v1275_v4 = vpack.c.bf16 %v1214_v17, %v1213_v0 }
 0x25b   : > { %1442 = vmatmul.bf16.gmra.mxu2 %v1275_v4  ;;  %v840_v4 = vadd.f32 %v2094_v55, %v839_v20 }
 0x25c   : > { %v1115_v7 = vpop.f32.mrf.mxu1 }
 0x25d   : > { %v1116_v29 = vadd.f32 %v2312_v37, %v1115_v7  ;;  %v905_v31 = vmax.f32 %v840_v4, 0.0 }
 0x25e   : > { %v2476_v28 = vpop.f32.mrf.mxu2 }
 0x25f   : > { %1154 = vmatmul.bf16.gmra.mxu3 %v951_v27  ;;  %v1215_v38 = vmax.f32 %v1116_v29, 0.0 }
 0x264   : > { %v1117_v30 = vpop.f32.mrf.mxu1 }
 0x265   : > { %v1118_v16 = vadd.f32 %v2312_v37, %v1117_v30  ;;  %v904_v30 = vmax.f32 %v838_v23, 0.0 }
 0x266   : > { %v2482_v36 = vpop.f32.mrf.mxu2 }
 0x267   : > { %v1216_v19 = vmax.f32 %v1118_v16, 0.0  ;;  %v954_v16 = vpack.c.bf16 %v905_v31, %v904_v30 }
 0x269   : > { %v1276_v21 = vpack.c.bf16 %v1216_v19, %v1215_v38 }
 0x26b   : > { %1447 = vmatmul.bf16.gmra.mxu2 %v1276_v21 }
 0x26c   : > { %v1120_v44 = vpop.f32.mrf.mxu1 }
 0x26d   : > { %v1121_v48 = vadd.f32 %v2312_v37, %v1120_v44 }
 0x26e   : > { %v2484_v46 = vpop.f32.mrf.mxu2 }
 0x26f   : > { %1159 = vmatmul.bf16.gmra.mxu3 %v952_v45  ;;  %v1217_v59 = vmax.f32 %v1121_v48, 0.0 }
 0x274   : > { %v1122_v52 = vpop.f32.mrf.mxu1 }
 0x275   : > { %v1123_v57 = vadd.f32 %v2312_v37, %v1122_v52 }
 0x276   : > { %v2492_v58 = vpop.f32.mrf.mxu2 }
 0x277   : > { %v1218_v61 = vmax.f32 %v1123_v57, 0.0  ;;  %v2514_v57 = vld [vmem:[%s2744_s7] ss:$0 sm:$0xff] }
 0x278   : > { %v1349_v6 = vadd.f32 %v2514_v57, %v2382_v60  ;;  %v1351_v4 = vadd.f32 %v2514_v57, %v2388_v3 }
 0x279   : > { %v1277_v9 = vpack.c.bf16 %v1218_v61, %v1217_v59 }
 0x27b   : > { %1452 = vmatmul.bf16.gmra.mxu2 %v1277_v9 }
 0x27c   : > { %v1125_v10 = vpop.f32.mrf.mxu1 }
 0x27d   : > { %v1126_v17 = vadd.f32 %v2312_v37, %v1125_v10 }
 0x27e   : > { %v2494_v0 = vpop.f32.mrf.mxu2 }
 0x27f   : > { %1164 = vmatmul.bf16.gmra.mxu3 %v953_v11  ;;  %v1219_v27 = vmax.f32 %v1126_v17, 0.0 }
 0x284   : > { %v1127_v22 = vpop.f32.mrf.mxu1 }
 0x285   : > { %v1128_v24 = vadd.f32 %v2312_v37, %v1127_v22 }
 0x286   : > { %v2498_v7 = vpop.f32.mrf.mxu2 }
 0x287   : > { %v1220_v29 = vmax.f32 %v1128_v24, 0.0 }
 0x289   : > { %v1278_v32 = vpack.c.bf16 %v1220_v29, %v1219_v27 }
 0x28b   : > { %1457 = vmatmul.bf16.gmra.mxu2 %v1278_v32 }
 0x28c   : > { %v1130_v35 = vpop.f32.mrf.mxu1 }
 0x28d   : > { %v1131_v19 = vadd.f32 %v2312_v37, %v1130_v35 }
 0x28e   : > { %v2500_v38 = vpop.f32.mrf.mxu2 }
 0x28f   : > { %1169 = vmatmul.bf16.gmra.mxu3 %v954_v16  ;;  %v1221_v44 = vmax.f32 %v1131_v19, 0.0 }
 0x294   : > { %v1132_v40 = vpop.f32.mrf.mxu1 }
 0x295   : > { %v1133_v41 = vadd.f32 %v2312_v37, %v1132_v40  ;;  %v1354_v40 = vadd.f32 %v2514_v57, %v2392_v18 }
 0x296   : > { %v2504_v21 = vpop.f32.mrf.mxu2 }
 0x297   : > { %v1222_v45 = vmax.f32 %v1133_v41, 0.0 }
 0x299   : > { %v1279_v47 = vpack.c.bf16 %v1222_v45, %v1221_v44 }
 0x29b   : > { %1462 = vmatmul.bf16.gmra.mxu2 %v1279_v47 }
 0x29e   : > { %v2506_v48 = vpop.f32.mrf.mxu2 }
 0x2a2   : > { %v1135_v52 = vpop.f32.mrf.mxu3 }
 0x2a3   : > { %v1136_v55 = vadd.f32 %v2312_v37, %v1135_v52 }
 0x2a5   : > { %v1223_v61 = vmax.f32 %v1136_v55, 0.0 }
 0x2a6   : > { %v2508_v53 = vpop.f32.mrf.mxu2 }
 0x2aa   : > { %v1137_v56 = vpop.f32.mrf.mxu3 }
 0x2ab   : > { %v1138_v59 = vadd.f32 %v2312_v37, %v1137_v56  ;;  %v1356_v56 = vadd.f32 %v2514_v57, %v2398_v25 }
 0x2ad   : > { %v1224_v1 = vmax.f32 %v1138_v59, 0.0 }
 0x2ae   : > { %v1428_v2 = vpop.f32.mrf.mxu2 }
 0x2af   : > { %v1280_v9 = vpack.c.bf16 %v1224_v1, %v1223_v61  ;;  %v1429_v10 = vadd.f32 %v2514_v57, %v1428_v2 }
 0x2b1   : > { %1467 = vmatmul.bf16.vlgmr.msra.gmra.mxu3 %v1280_v9  ;;  %v1508_v11 = vsub.f32 %v1429_v10, %v1349_v6 }
 0x2b2   : > { %v1140_v20 = vpop.f32.mrf.mxu3 }
 0x2b3   : > { %v1540_v17 = vmin.f32 %v1508_v11, 0.0  ;;  %v1141_v27 = vadd.f32 %v2312_v37, %v1140_v20 }
 0x2b5   : > { %v1573_v22 = vsel %vm1572_vm1, %v1540_v17, 0.0  ;;  %v1225_v32 = vmax.f32 %v1141_v27, 0.0  ;;  %v1359_v17 = vadd.f32 %v2514_v57, %v2402_v34  ;;  %v2547_v34 = vld [vmem:[%s2742_s5] ss:$0 sm:$0xff] }
 0x2b6   : > { %v1430_v23 = vpop.f32.mrf.mxu2  ;;  %1574 = vadd.xlane.f32.xlu0 %v1573_v22 }
 0x2b7   : > { %v1431_v24 = vadd.f32 %v2514_v57, %v1430_v23 }
 0x2b9   : > { %v1509_v60 = vsub.f32 %v1431_v24, %v1351_v4 }
 0x2ba   : > { %v1142_v29 = vpop.f32.mrf.mxu3 }
 0x2bb   : > { %v1143_v30 = vadd.f32 %v2312_v37, %v1142_v29  ;;  %v1541_v31 = vmin.f32 %v1509_v60, 0.0  ;;  %v1361_v60 = vadd.f32 %v2514_v57, %v2408_v39  ;;  %v1364_v39 = vadd.f32 %v2514_v57, %v2412_v49 }
 0x2bd   : > { %v1226_v35 = vmax.f32 %v1143_v30, 0.0  ;;  %v1576_v16 = vsel %vm1572_vm1, %v1541_v31, 0.0 }
 0x2be   : > { %v1433_v19 = vpop.f32.mrf.mxu2  ;;  %1577 = vadd.xlane.f32.xlu0 %v1576_v16 }
 0x2bf   : > { %v1434_v3 = vadd.f32 %v2514_v57, %v1433_v19  ;;  %v1281_v41 = vpack.c.bf16 %v1226_v35, %v1225_v32 }
 0x2c1   : > { %1472 = vmatmul.bf16.gmra.mxu3 %v1281_v41  ;;  %v1510_v44 = vsub.f32 %v1434_v3, %v1354_v40 }
 0x2c2   : > { %v1145_v45 = vpop.f32.mrf.mxu3 }
 0x2c3   : > { %v1542_v47 = vmin.f32 %v1510_v44, 0.0  ;;  %v1146_v61 = vadd.f32 %v2312_v37, %v1145_v45 }
 0x2c5   : > { %v1579_v52 = vsel %vm1572_vm1, %v1542_v47, 0.0  ;;  %v1227_v9 = vmax.f32 %v1146_v61, 0.0  ;;  %v1366_v61 = vadd.f32 %v2514_v57, %v2416_v54 }
 0x2c6   : > { %v1435_v55 = vpop.f32.mrf.mxu2  ;;  %1580 = vadd.xlane.f32.xlu1 %v1579_v52 }
 0x2c7   : > { %v1436_v59 = vadd.f32 %v2514_v57, %v1435_v55 }
 0x2c9   : > { %v1511_v1 = vsub.f32 %v1436_v59, %v1356_v56 }
 0x2ca   : > { %v1147_v18 = vpop.f32.mrf.mxu3 }
 0x2cb   : > { %v1148_v2 = vadd.f32 %v2312_v37, %v1147_v18  ;;  %v1543_v6 = vmin.f32 %v1511_v1, 0.0 }
 0x2cd   : > { %v1228_v10 = vmax.f32 %v1148_v2, 0.0  ;;  %v1582_v11 = vsel %vm1572_vm1, %v1543_v6, 0.0 }
 0x2ce   : > { %v1438_v20 = vpop.f32.mrf.mxu2  ;;  %1583 = vadd.xlane.f32.xlu1 %v1582_v11 }
 0x2cf   : > { %v1439_v25 = vadd.f32 %v2514_v57, %v1438_v20  ;;  %v1282_v22 = vpack.c.bf16 %v1228_v10, %v1227_v9 }
 0x2d1   : > { %1477 = vmatmul.bf16.gmra.mxu3 %v1282_v22  ;;  %v1512_v23 = vsub.f32 %v1439_v25, %v1359_v17  ;;  %v1369_v25 = vadd.f32 %v2514_v57, %v2420_v5 }
 0x2d2   : > { %v1150_v4 = vpop.f32.mrf.mxu3 }
 0x2d3   : > { %v1544_v24 = vmin.f32 %v1512_v23, 0.0  ;;  %v1151_v30 = vadd.f32 %v2547_v34, %v1150_v4 }
 0x2d5   : > { %v1585_v27 = vsel %vm1572_vm1, %v1544_v24, 0.0  ;;  %v1229_v19 = vmax.f32 %v1151_v30, 0.0 }
 0x2d6   : > { %v1440_v37 = vpop.f32.mrf.mxu2  ;;  %1586 = vadd.xlane.f32.xlu2 %v1585_v27 }
 0x2d7   : > { %v1441_v29 = vadd.f32 %v2514_v57, %v1440_v37 }
 0x2d9   : > { %v1513_v31 = vsub.f32 %v1441_v29, %v1361_v60  ;;  %v1371_v60 = vadd.f32 %v2514_v57, %v2424_v13 }
 0x2da   : > { %v1152_v32 = vpop.f32.mrf.mxu3 }
 0x2db   : > { %v1153_v35 = vadd.f32 %v2547_v34, %v1152_v32  ;;  %v1545_v16 = vmin.f32 %v1513_v31, 0.0 }
 0x2dd   : > { %v1230_v40 = vmax.f32 %v1153_v35, 0.0  ;;  %v1588_v3 = vsel %vm1572_vm1, %v1545_v16, 0.0 }
 0x2de   : > { %v1443_v41 = vpop.f32.mrf.mxu2  ;;  %1589 = vadd.xlane.f32.xlu2 %v1588_v3 }
 0x2df   : > { %v1444_v44 = vadd.f32 %v2514_v57, %v1443_v41  ;;  %v1283_v45 = vpack.c.bf16 %v1230_v40, %v1229_v19  ;;  %v1374_v41 = vadd.f32 %v2514_v57, %v2428_v8 }
 0x2e1   : > { %v1514_v47 = vsub.f32 %v1444_v44, %v1364_v39  ;;  %1482 = vmatmul.bf16.gmra.mxu3 %v1283_v45 }
 0x2e2   : > { %v1155_v52 = vpop.f32.mrf.mxu3 }
 0x2e3   : > { %v1546_v55 = vmin.f32 %v1514_v47, 0.0  ;;  %v1156_v18 = vadd.f32 %v2547_v34, %v1155_v52 }
 0x2e5   : > { %v1591_v56 = vsel %vm1572_vm1, %v1546_v55, 0.0  ;;  %v1231_v10 = vmax.f32 %v1156_v18, 0.0 }
 0x2e6   : > { %v1445_v59 = vpop.f32.mrf.mxu2  ;;  %1592 = vadd.xlane.f32.xlu0 %v1591_v56  ;;  %v1376_v56 = vadd.f32 %v2514_v57, %v2432_v12 }
 0x2e7   : > { %v1446_v1 = vadd.f32 %v2514_v57, %v1445_v59 }
 0x2e9   : > { %v1515_v2 = vsub.f32 %v1446_v1, %v1366_v61 }
 0x2ea   : > { %v1157_v49 = vpop.f32.mrf.mxu3 }
 0x2eb   : > { %v1158_v6 = vadd.f32 %v2547_v34, %v1157_v49  ;;  %v1547_v9 = vmin.f32 %v1515_v2, 0.0 }
 0x2ed   : > { %v1232_v11 = vmax.f32 %v1158_v6, 0.0  ;;  %v1594_v20 = vsel %vm1572_vm1, %v1547_v9, 0.0 }
 0x2ee   : > { %v1448_v17 = vpop.f32.mrf.mxu2  ;;  %1595 = vadd.xlane.f32.xlu1 %v1594_v20 }
 0x2ef   : > { %v1284_v22 = vpack.c.bf16 %v1232_v11, %v1231_v10  ;;  %v1449_v54 = vadd.f32 %v2514_v57, %v1448_v17  ;;  %v1379_v11 = vadd.f32 %v2514_v57, %v2436_v43 }
 0x2f1   : > { %v1516_v23 = vsub.f32 %v1449_v54, %v1369_v25  ;;  %1487 = vmatmul.bf16.gmra.mxu3 %v1284_v22 }
 0x2f2   : > { %v1160_v4 = vpop.f32.mrf.mxu3 }
 0x2f3   : > { %v1548_v24 = vmin.f32 %v1516_v23, 0.0  ;;  %v1161_v30 = vadd.f32 %v2547_v34, %v1160_v4  ;;  %v1381_v4 = vadd.f32 %v2514_v57, %v2440_v50 }
 0x2f5   : > { %v1597_v27 = vsel %vm1572_vm1, %v1548_v24, 0.0  ;;  %v1233_v16 = vmax.f32 %v1161_v30, 0.0 }
 0x2f6   : > { %v1450_v37 = vpop.f32.mrf.mxu2  ;;  %1598 = vadd.xlane.f32.xlu2 %v1597_v27 }
 0x2f7   : > { %v1451_v29 = vadd.f32 %v2514_v57, %v1450_v37 }
 0x2f9   : > { %v1517_v31 = vsub.f32 %v1451_v29, %v1371_v60 }
 0x2fa   : > { %v1162_v5 = vpop.f32.mrf.mxu3 }
 0x2fb   : > { %v1163_v32 = vadd.f32 %v2547_v34, %v1162_v5  ;;  %v1549_v35 = vmin.f32 %v1517_v31, 0.0 }
 0x2fd   : > { %v1234_v19 = vmax.f32 %v1163_v32, 0.0  ;;  %v1600_v40 = vsel %vm1572_vm1, %v1549_v35, 0.0  ;;  %v1384_v35 = vadd.f32 %v2514_v57, %v2444_v63 }
 0x2fe   : > { %v1453_v3 = vpop.f32.mrf.mxu2  ;;  %1601 = vadd.xlane.f32.xlu0 %v1600_v40 }
 0x2ff   : > { %v1285_v39 = vpack.c.bf16 %v1234_v19, %v1233_v16  ;;  %v1454_v13 = vadd.f32 %v2514_v57, %v1453_v3 }
 0x301   : > { %v1518_v44 = vsub.f32 %v1454_v13, %v1374_v41  ;;  %1492 = vmatmul.bf16.gmra.mxu3 %v1285_v39  ;;  %v1386_v41 = vadd.f32 %v2514_v57, %v2450_v14 }
 0x302   : > { %v1165_v45 = vpop.f32.mrf.mxu3 }
 0x303   : > { %v1550_v47 = vmin.f32 %v1518_v44, 0.0  ;;  %v1166_v61 = vadd.f32 %v2547_v34, %v1165_v45 }
 0x305   : > { %v1603_v52 = vsel %vm1572_vm1, %v1550_v47, 0.0  ;;  %v1235_v49 = vmax.f32 %v1166_v61, 0.0 }
 0x306   : > { %v1455_v55 = vpop.f32.mrf.mxu2  ;;  %1604 = vadd.xlane.f32.xlu1 %v1603_v52  ;;  %v1389_v52 = vadd.f32 %v2514_v57, %v2452_v26 }
 0x307   : > { %v1456_v59 = vadd.f32 %v2514_v57, %v1455_v55 }
 0x309   : > { %v1519_v1 = vsub.f32 %v1456_v59, %v1376_v56 }
 0x30a   : > { %v1167_v8 = vpop.f32.mrf.mxu3 }
 0x30b   : > { %v1168_v18 = vadd.f32 %v2547_v34, %v1167_v8  ;;  %v1551_v2 = vmin.f32 %v1519_v1, 0.0 }
 0x30d   : > { %v1236_v6 = vmax.f32 %v1168_v18, 0.0  ;;  %v1606_v9 = vsel %vm1572_vm1, %v1551_v2, 0.0  ;;  %v1391_v18 = vadd.f32 %v2514_v57, %v2458_v33 }
 0x30e   : > { %v1458_v10 = vpop.f32.mrf.mxu2  ;;  %1607 = vadd.xlane.f32.xlu2 %v1606_v9 }
 0x30f   : > { %v1286_v20 = vpack.c.bf16 %v1236_v6, %v1235_v49  ;;  %v1459_v12 = vadd.f32 %v2514_v57, %v1458_v10 }
 0x311   : > { %v1520_v17 = vsub.f32 %v1459_v12, %v1379_v11  ;;  %1497 = vmatmul.bf16.gmra.mxu3 %v1286_v20  ;;  %v1394_v11 = vadd.f32 %v2514_v57, %v2460_v42 }
 0x312   : > { %v1170_v25 = vpop.f32.mrf.mxu3 }
 0x313   : > { %v1552_v22 = vmin.f32 %v1520_v17, 0.0  ;;  %v1171_v27 = vadd.f32 %v2547_v34, %v1170_v25 }
 0x315   : > { %v1609_v54 = vsel %vm1572_vm1, %v1552_v22, 0.0  ;;  %v1237_v30 = vmax.f32 %v1171_v27, 0.0 }
 0x316   : > { %v1460_v23 = vpop.f32.mrf.mxu2  ;;  %1610 = vadd.xlane.f32.xlu0 %v1609_v54  ;;  %v1396_v54 = vadd.f32 %v2514_v57, %v2466_v51 }
 0x317   : > { %v1461_v24 = vadd.f32 %v2514_v57, %v1460_v23 }
 0x319   : > { %v1521_v43 = vsub.f32 %v1461_v24, %v1381_v4 }
 0x31a   : > { %v1172_v37 = vpop.f32.mrf.mxu3 }
 0x31b   : > { %v1173_v60 = vadd.f32 %v2547_v34, %v1172_v37  ;;  %v1553_v29 = vmin.f32 %v1521_v43, 0.0  ;;  %v1399_v37 = vadd.f32 %v2514_v57, %v2468_v62 }
 0x31d   : > { %v1238_v31 = vmax.f32 %v1173_v60, 0.0  ;;  %v1612_v5 = vsel %vm1572_vm1, %v1553_v29, 0.0 }
 0x31e   : > { %v1463_v32 = vpop.f32.mrf.mxu2  ;;  %1613 = vadd.xlane.f32.xlu1 %v1612_v5 }
 0x31f   : > { %v1287_v50 = vpack.c.bf16 %v1238_v31, %v1237_v30  ;;  %v1464_v16 = vadd.f32 %v2514_v57, %v1463_v32  ;;  %v1401_v32 = vadd.f32 %v2514_v57, %v2474_v15 }
 0x321   : > { %v1522_v19 = vsub.f32 %v1464_v16, %v1384_v35  ;;  %1502 = vmatmul.bf16.gmra.mxu3 %v1287_v50 }
 0x323   : > { %v1554_v40 = vmin.f32 %v1522_v19, 0.0 }
 0x325   : > { %v1615_v3 = vsel %vm1572_vm1, %v1554_v40, 0.0 }
 0x326   : > { %v1465_v34 = vpop.f32.mrf.mxu2  ;;  %1616 = vadd.xlane.f32.xlu2 %v1615_v3  ;;  %v1404_v3 = vadd.f32 %v2514_v57, %v2476_v28 }
 0x327   : > { %v1466_v39 = vadd.f32 %v2514_v57, %v1465_v34 }
 0x329   : > { %v1523_v63 = vsub.f32 %v1466_v39, %v1386_v41  ;;  %v1575_v13 = vpop.xlane.xlu0 %1574 }
 0x32a   : > { %1670 = vst.msk [vmem:[%s2603_s26] sm:$0xff] %vm1669_vm2, %v1575_v13 }
 0x32b   : > { %v1555_v44 = vmin.f32 %v1523_v63, 0.0 }
 0x32d   : > { %v1618_v45 = vsel %vm1572_vm1, %v1555_v44, 0.0  ;;  %v1406_v44 = vadd.f32 %v2514_v57, %v2482_v36 }
 0x32e   : > { %1619 = vadd.xlane.f32.xlu0 %v1618_v45 }
 0x331   : > { %v1578_v14 = vpop.xlane.xlu0 %1577 }
 0x332   : > { %1671 = vst.msk [vmem:[%s2603_s26 + $0x8] sm:$0xff] %vm1669_vm2, %v1578_v14 }
 0x334   : > { %v1468_v47 = vpop.f32.mrf.mxu3 }
 0x335   : > { %v1469_v55 = vadd.f32 %v2514_v57, %v1468_v47 }
 0x337   : > { %v1524_v56 = vsub.f32 %v1469_v55, %v1389_v52 }
 0x339   : > { %v1581_v59 = vpop.xlane.xlu1 %1580  ;;  %v1556_v61 = vmin.f32 %v1524_v56, 0.0  ;;  %v1409_v56 = vadd.f32 %v2514_v57, %v2484_v46 }
 0x33a   : > { %1672 = vst.msk [vmem:[%s2603_s26 + $0x10] sm:$0xff] %vm1669_vm2, %v1581_v59 }
 0x33b   : > { %v1621_v1 = vsel %vm1572_vm1, %v1556_v61, 0.0 }
 0x33c   : > { %v1470_v8 = vpop.f32.mrf.mxu3  ;;  %1622 = vadd.xlane.f32.xlu1 %v1621_v1 }
 0x33d   : > { %v1471_v2 = vadd.f32 %v2514_v57, %v1470_v8 }
 0x33f   : > { %v1525_v49 = vsub.f32 %v1471_v2, %v1391_v18  ;;  %v1411_v2 = vadd.f32 %v2514_v57, %v2492_v58 }
 0x341   : > { %v1584_v6 = vpop.xlane.xlu1 %1583  ;;  %v1557_v26 = vmin.f32 %v1525_v49, 0.0 }
 0x342   : > { %1673 = vst.msk [vmem:[%s2603_s26 + $0x18] sm:$0xff] %vm1669_vm2, %v1584_v6 }
 0x343   : > { %v1624_v9 = vsel %vm1572_vm1, %v1557_v26, 0.0 }
 0x344   : > { %v1473_v10 = vpop.f32.mrf.mxu3  ;;  %1625 = vadd.xlane.f32.xlu2 %v1624_v9 }
 0x345   : > { %v1474_v20 = vadd.f32 %v2514_v57, %v1473_v10 }
 0x347   : > { %v1526_v12 = vsub.f32 %v1474_v20, %v1394_v11  ;;  %v1414_v11 = vadd.f32 %v2514_v57, %v2494_v0 }
 0x349   : > { %v1587_v17 = vpop.xlane.xlu2 %1586  ;;  %v1558_v33 = vmin.f32 %v1526_v12, 0.0 }
 0x34a   : > { %1674 = vst.msk [vmem:[%s2603_s26 + $0x20] sm:$0xff] %vm1669_vm2, %v1587_v17 }
 0x34b   : > { %v1627_v25 = vsel %vm1572_vm1, %v1558_v33, 0.0 }
 0x34c   : > { %v1475_v22 = vpop.f32.mrf.mxu3  ;;  %1628 = vadd.xlane.f32.xlu0 %v1627_v25 }
 0x34d   : > { %v1476_v23 = vadd.f32 %v2514_v57, %v1475_v22  ;;  %v1416_v22 = vadd.f32 %v2514_v57, %v2498_v7 }
 0x34f   : > { %v1527_v4 = vsub.f32 %v1476_v23, %v1396_v54 }
 0x351   : > { %v1590_v24 = vpop.xlane.xlu2 %1589  ;;  %v1559_v42 = vmin.f32 %v1527_v4, 0.0 }
 0x352   : > { %1675 = vst.msk [vmem:[%s2603_s26 + $0x28] sm:$0xff] %vm1669_vm2, %v1590_v24 }
 0x353   : > { %v1630_v27 = vsel %vm1572_vm1, %v1559_v42, 0.0 }
 0x354   : > { %v1478_v43 = vpop.f32.mrf.mxu3  ;;  %1631 = vadd.xlane.f32.xlu1 %v1630_v27  ;;  %v1419_v27 = vadd.f32 %v2514_v57, %v2500_v38 }
 0x355   : > { %v1479_v60 = vadd.f32 %v2514_v57, %v1478_v43 }
 0x357   : > { %v1528_v29 = vsub.f32 %v1479_v60, %v1399_v37 }
 0x359   : > { %v1593_v30 = vpop.xlane.xlu0 %1592  ;;  %v1560_v51 = vmin.f32 %v1528_v29, 0.0 }
 0x35a   : > { %1676 = vst.msk [vmem:[%s2603_s26 + $0x30] sm:$0xff] %vm1669_vm2, %v1593_v30 }
 0x35b   : > { %v1633_v31 = vsel %vm1572_vm1, %v1560_v51, 0.0  ;;  %v1421_v51 = vadd.f32 %v2514_v57, %v2504_v21 }
 0x35c   : > { %v1480_v5 = vpop.f32.mrf.mxu3  ;;  %1634 = vadd.xlane.f32.xlu2 %v1633_v31 }
 0x35d   : > { %v1481_v35 = vadd.f32 %v2514_v57, %v1480_v5 }
 0x35f   : > { %v1529_v50 = vsub.f32 %v1481_v35, %v1401_v32 }
 0x361   : > { %v1596_v16 = vpop.xlane.xlu1 %1595  ;;  %v1561_v62 = vmin.f32 %v1529_v50, 0.0 }
 0x362   : > { %1677 = vst.msk [vmem:[%s2603_s26 + $0x38] sm:$0xff] %vm1669_vm2, %v1596_v16  ;;  %v1424_v16 = vadd.f32 %v2514_v57, %v2506_v48 }
 0x363   : > { %v1636_v19 = vsel %vm1572_vm1, %v1561_v62, 0.0 }
 0x364   : > { %v1483_v40 = vpop.f32.mrf.mxu3  ;;  %1637 = vadd.xlane.f32.xlu0 %v1636_v19 }
 0x365   : > { %v1484_v34 = vadd.f32 %v2514_v57, %v1483_v40 }
 0x367   : > { %v1530_v41 = vsub.f32 %v1484_v34, %v1404_v3  ;;  %v1426_v34 = vadd.f32 %v2514_v57, %v2508_v53 }
 0x369   : > { %v1599_v39 = vpop.xlane.xlu2 %1598  ;;  %v1562_v15 = vmin.f32 %v1530_v41, 0.0 }
 0x36a   : > { %1678 = vst.msk [vmem:[%s2603_s26 + $0x40] sm:$0xff] %vm1669_vm2, %v1599_v39 }
 0x36b   : > { %v1639_v63 = vsel %vm1572_vm1, %v1562_v15, 0.0 }
 0x36c   : > { %v1485_v13 = vpop.f32.mrf.mxu3  ;;  %1640 = vadd.xlane.f32.xlu1 %v1639_v63 }
 0x36d   : > { %v1486_v45 = vadd.f32 %v2514_v57, %v1485_v13 }
 0x36f   : > { %v1531_v14 = vsub.f32 %v1486_v45, %v1406_v44 }
 0x371   : > { %v1602_v47 = vpop.xlane.xlu0 %1601  ;;  %v1563_v28 = vmin.f32 %v1531_v14, 0.0 }
 0x372   : > { %1679 = vst.msk [vmem:[%s2603_s26 + $0x48] sm:$0xff] %vm1669_vm2, %v1602_v47 }
 0x373   : > { %v1642_v52 = vsel %vm1572_vm1, %v1563_v28, 0.0 }
 0x374   : > { %v1488_v55 = vpop.f32.mrf.mxu3  ;;  %1643 = vadd.xlane.f32.xlu2 %v1642_v52 }
 0x375   : > { %v1489_v59 = vadd.f32 %v2514_v57, %v1488_v55 }
 0x377   : > { %v1532_v61 = vsub.f32 %v1489_v59, %v1409_v56 }
 0x379   : > { %v1605_v1 = vpop.xlane.xlu1 %1604  ;;  %v1564_v36 = vmin.f32 %v1532_v61, 0.0 }
 0x37a   : > { %1680 = vst.msk [vmem:[%s2603_s26 + $0x50] sm:$0xff] %vm1669_vm2, %v1605_v1 }
 0x37b   : > { %v1645_v8 = vsel %vm1572_vm1, %v1564_v36, 0.0 }
 0x37c   : > { %v1490_v18 = vpop.f32.mrf.mxu3  ;;  %1646 = vadd.xlane.f32.xlu0 %v1645_v8 }
 0x37d   : > { %v1491_v49 = vadd.f32 %v2514_v57, %v1490_v18 }
 0x37f   : > { %v1533_v6 = vsub.f32 %v1491_v49, %v1411_v2 }
 0x381   : > { %v1608_v26 = vpop.xlane.xlu2 %1607  ;;  %v1565_v46 = vmin.f32 %v1533_v6, 0.0 }
 0x382   : > { %1681 = vst.msk [vmem:[%s2603_s26 + $0x58] sm:$0xff] %vm1669_vm2, %v1608_v26 }
 0x383   : > { %v1648_v9 = vsel %vm1572_vm1, %v1565_v46, 0.0 }
 0x384   : > { %v1493_v10 = vpop.f32.mrf.mxu3  ;;  %1649 = vadd.xlane.f32.xlu1 %v1648_v9 }
 0x385   : > { %v1494_v20 = vadd.f32 %v2514_v57, %v1493_v10 }
 0x387   : > { %v1534_v12 = vsub.f32 %v1494_v20, %v1414_v11 }
 0x389   : > { %v1611_v17 = vpop.xlane.xlu0 %1610  ;;  %v1566_v58 = vmin.f32 %v1534_v12, 0.0 }
 0x38a   : > { %1682 = vst.msk [vmem:[%s2603_s26 + $0x60] sm:$0xff] %vm1669_vm2, %v1611_v17 }
 0x38b   : > { %v1651_v33 = vsel %vm1572_vm1, %v1566_v58, 0.0 }
 0x38c   : > { %v1495_v25 = vpop.f32.mrf.mxu3  ;;  %1652 = vadd.xlane.f32.xlu2 %v1651_v33 }
 0x38d   : > { %v1496_v54 = vadd.f32 %v2514_v57, %v1495_v25 }
 0x38f   : > { %v1535_v23 = vsub.f32 %v1496_v54, %v1416_v22 }
 0x391   : > { %v1614_v4 = vpop.xlane.xlu1 %1613  ;;  %v1567_v0 = vmin.f32 %v1535_v23, 0.0 }
 0x392   : > { %1683 = vst.msk [vmem:[%s2603_s26 + $0x68] sm:$0xff] %vm1669_vm2, %v1614_v4 }
 0x393   : > { %v1654_v24 = vsel %vm1572_vm1, %v1567_v0, 0.0 }
 0x394   : > { %v1498_v42 = vpop.f32.mrf.mxu3  ;;  %1655 = vadd.xlane.f32.xlu0 %v1654_v24 }
 0x395   : > { %v1499_v43 = vadd.f32 %v2514_v57, %v1498_v42 }
 0x397   : > { %v1536_v37 = vsub.f32 %v1499_v43, %v1419_v27 }
 0x399   : > { %v1617_v60 = vpop.xlane.xlu2 %1616  ;;  %v1568_v7 = vmin.f32 %v1536_v37, 0.0 }
 0x39a   : > { %1684 = vst.msk [vmem:[%s2603_s26 + $0x70] sm:$0xff] %vm1669_vm2, %v1617_v60 }
 0x39b   : > { %v1657_v29 = vsel %vm1572_vm1, %v1568_v7, 0.0 }
 0x39c   : > { %v1500_v30 = vpop.f32.mrf.mxu3  ;;  %1658 = vadd.xlane.f32.xlu1 %v1657_v29 }
 0x39d   : > { %v1501_v31 = vadd.f32 %v2514_v57, %v1500_v30 }
 0x39f   : > { %v1537_v5 = vsub.f32 %v1501_v31, %v1421_v51 }
 0x3a1   : > { %v1620_v32 = vpop.xlane.xlu0 %1619  ;;  %v1569_v35 = vmin.f32 %v1537_v5, 0.0 }
 0x3a2   : > { %1685 = vst.msk [vmem:[%s2603_s26 + $0x78] sm:$0xff] %vm1669_vm2, %v1620_v32 }
 0x3a3   : > { %v1660_v38 = vsel %vm1572_vm1, %v1569_v35, 0.0 }
 0x3a4   : > { %v1503_v50 = vpop.f32.mrf.mxu3  ;;  %1661 = vadd.xlane.f32.xlu2 %v1660_v38 }
 0x3a5   : > { %v1504_v62 = vadd.f32 %v2514_v57, %v1503_v50 }
 0x3a7   : > { %v1538_v19 = vsub.f32 %v1504_v62, %v1424_v16 }
 0x3a9   : > { %v1570_v21 = vmin.f32 %v1538_v19, 0.0 }
 0x3ab   : > { %v1663_v40 = vsel %vm1572_vm1, %v1570_v21, 0.0 }
 0x3ac   : > { %v1505_v3 = vpop.f32.mrf.mxu3  ;;  %1664 = vadd.xlane.f32.xlu0 %v1663_v40 }
 0x3ad   : > { %v1506_v41 = vadd.f32 %v2514_v57, %v1505_v3 }
 0x3af   : > { %v1539_v39 = vsub.f32 %v1506_v41, %v1426_v34  ;;  %v1623_v48 = vpop.xlane.xlu1 %1622 }
 0x3b0   : > { %1686 = vst.msk [vmem:[%s2603_s26 + $0x80] sm:$0xff] %vm1669_vm2, %v1623_v48 }
 0x3b1   : > { %v1571_v15 = vmin.f32 %v1539_v39, 0.0 }
 0x3b3   : > { %v1666_v63 = vsel %vm1572_vm1, %v1571_v15, 0.0 }
 0x3b4   : > { %1667 = vadd.xlane.f32.xlu1 %v1666_v63 }
 0x3b7   : > { %v1626_v13 = vpop.xlane.xlu2 %1625 }
 0x3b8   : > { %1687 = vst.msk [vmem:[%s2603_s26 + $0x88] sm:$0xff] %vm1669_vm2, %v1626_v13 }
 0x3bf   : > { %v1629_v44 = vpop.xlane.xlu0 %1628 }
 0x3c0   : > { %1688 = vst.msk [vmem:[%s2603_s26 + $0x90] sm:$0xff] %vm1669_vm2, %v1629_v44 }
 0x3c7   : > { %v1632_v53 = vpop.xlane.xlu1 %1631 }
 0x3c8   : > { %1689 = vst.msk [vmem:[%s2603_s26 + $0x98] sm:$0xff] %vm1669_vm2, %v1632_v53 }
 0x3cf   : > { %v1635_v57 = vpop.xlane.xlu2 %1634 }
 0x3d0   : > { %1690 = vst.msk [vmem:[%s2603_s26 + $0xa0] sm:$0xff] %vm1669_vm2, %v1635_v57 }
 0x3d7   : > { %v1638_v45 = vpop.xlane.xlu0 %1637 }
 0x3d8   : > { %1691 = vst.msk [vmem:[%s2603_s26 + $0xa8] sm:$0xff] %vm1669_vm2, %v1638_v45 }
 0x3df   : > { %v1641_v14 = vpop.xlane.xlu1 %1640 }
 0x3e0   : > { %1692 = vst.msk [vmem:[%s2603_s26 + $0xb0] sm:$0xff] %vm1669_vm2, %v1641_v14 }
 0x3e7   : > { %v1644_v47 = vpop.xlane.xlu2 %1643 }
 0x3e8   : > { %1693 = vst.msk [vmem:[%s2603_s26 + $0xb8] sm:$0xff] %vm1669_vm2, %v1644_v47 }
 0x3ef   : > { %v1647_v28 = vpop.xlane.xlu0 %1646 }
 0x3f0   : > { %1694 = vst.msk [vmem:[%s2603_s26 + $0xc0] sm:$0xff] %vm1669_vm2, %v1647_v28 }
 0x3f7   : > { %v1650_v52 = vpop.xlane.xlu1 %1649 }
 0x3f8   : > { %1695 = vst.msk [vmem:[%s2603_s26 + $0xc8] sm:$0xff] %vm1669_vm2, %v1650_v52 }
 0x3ff   : > { %v1653_v55 = vpop.xlane.xlu2 %1652 }
 0x400   : > { %1696 = vst.msk [vmem:[%s2603_s26 + $0xd0] sm:$0xff] %vm1669_vm2, %v1653_v55 }
 0x407   : > { %v1656_v56 = vpop.xlane.xlu0 %1655 }
 0x408   : > { %1697 = vst.msk [vmem:[%s2603_s26 + $0xd8] sm:$0xff] %vm1669_vm2, %v1656_v56 }
 0x40f   : > { %v1659_v59 = vpop.xlane.xlu1 %1658 }
 0x410   : > { %1698 = vst.msk [vmem:[%s2603_s26 + $0xe0] sm:$0xff] %vm1669_vm2, %v1659_v59 }
 0x417   : > { %v1662_v61 = vpop.xlane.xlu2 %1661 }
 0x418   : > { %1699 = vst.msk [vmem:[%s2603_s26 + $0xe8] sm:$0xff] %vm1669_vm2, %v1662_v61 }
 0x41f   : > { %v1665_v1 = vpop.xlane.xlu0 %1664 }
 0x420   : > { %1700 = vst.msk [vmem:[%s2603_s26 + $0xf0] sm:$0xff] %vm1669_vm2, %v1665_v1 }
 0x427   : > { %v1668_v36 = vpop.xlane.xlu1 %1667 }
 0x428   : > { %1701 = vst.msk [vmem:[%s2603_s26 + $0xf8] sm:$0xff] %vm1669_vm2, %v1668_v36 }
 0x429 PF: > { %s18_s27 = sadd.s32 1, %s2102_s27  }
 0x42a   : > { %p15_p4 = scmp.ge.s32.totalorder %s18_s27, 6  }
 0x42c   :  { %17 = sbr.rel (!%p15_p4) target bundleno = 1 (0x1), region = 85 }

</bundles_post_ra>
